<compile_context>
chip_gen: v5e
topology: v5e:2x2
jax: 0.10.0
libtpu: 0.0.40
codegen_flags: <defaults>
</compile_context>

<pallas_src>
import functools

import jax
import jax.numpy as jnp
import numpy as np
from jax.experimental import pallas as pl
from jax.experimental.pallas import tpu as pltpu

_LANE = 128
_MAX_TM = 512    # row-tile cap; tm is also limited to n_pad//2 so v7x's 2 TCs both get work
_MAX_TK = 2048   # reduction-tile cap; adj block tm*tk*2B double-buffered stays <= 4 MiB


def _round_up(x, m):
    return ((x + m - 1) // m) * m


def _vmem_limit_bytes():
    """Generation-aware VMEM budget: ~96 MiB on v5e/v6e (128 MiB phys), ~48 MiB on v7x (64 MiB)."""
    cap = 64 * 1024 * 1024
    try:
        cap = int(pltpu.get_tpu_info().vmem_capacity_bytes)
    except Exception:
        pass
    return max(32 << 20, min(cap * 3 // 4, 100 << 20))


def _pick_tile(n_pad, max_tile):
    """Largest multiple of 128 that divides n_pad and is <= max_tile (no partial tiles)."""
    best = _LANE
    t = _LANE
    while t <= min(n_pad, max_tile):
        if n_pad % t == 0:
            best = t
        t += _LANE
    return best


# --------------------------------------------------------------------------- kernels

def _transform_kernel(x_ref, w_ref, o_ref):
    """One row tile of HW1 = X @ W1 (weight resident, f32 MXU accumulation)."""
    o_ref[...] = jnp.dot(x_ref[...], w_ref[...],
                         preferred_element_type=jnp.float32).astype(o_ref.dtype)


def _gcn_layer_kernel(adj_ref, hw_ref, b_ref, wn_ref, o_ref, acc_ref, *,
                      tk, hw_resident):
    """acc[i] += adj[i,k] @ HW[k]; at last k: HW_next = relu(acc + b) @ W_next."""
    k = pl.program_id(1)

    @pl.when(k == 0)
    def _():
        acc_ref[...] = jnp.zeros_like(acc_ref)

    if hw_resident:
        off = pl.multiple_of(k * tk, _LANE)
        hw_blk = hw_ref[pl.ds(off, tk), :]
    else:
        hw_blk = hw_ref[...]
    acc_ref[...] += jnp.dot(adj_ref[...], hw_blk,
                            preferred_element_type=jnp.float32)

    @pl.when(k == pl.num_programs(1) - 1)
    def _():
        h = jnp.maximum(acc_ref[...] + b_ref[...], 0.0).astype(jnp.bfloat16)
        o_ref[...] = jnp.dot(h, wn_ref[...],
                             preferred_element_type=jnp.float32).astype(o_ref.dtype)


def _final_layer_kernel(adj_ref, hw_ref, b_ref, pool_ref, wc_ref, bc_ref,
                        o_ref, acc_ref, pooled_ref, *, tk, hw_resident):
    """Last GCN layer fused with global_mean_pool + classifier.

    acc[i]  += adj[i,k] @ HW[k]                    (per row tile, f32)
    pooled  += pool[:, i] @ relu(acc[i] + b)       (at last k of each row tile, f32)
    logits   = pooled @ Wc + bc                    (only at the final grid step)
    """
    i = pl.program_id(0)
    k = pl.program_id(1)

    @pl.when(jnp.logical_and(i == 0, k == 0))
    def _():
        pooled_ref[...] = jnp.zeros_like(pooled_ref)

    @pl.when(k == 0)
    def _():
        acc_ref[...] = jnp.zeros_like(acc_ref)

    if hw_resident:
        off = pl.multiple_of(k * tk, _LANE)
        hw_blk = hw_ref[pl.ds(off, tk), :]
    else:
        hw_blk = hw_ref[...]
    acc_ref[...] += jnp.dot(adj_ref[...], hw_blk,
                            preferred_element_type=jnp.float32)

    @pl.when(k == pl.num_programs(1) - 1)
    def _():
        h = jnp.maximum(acc_ref[...] + b_ref[...], 0.0)
        pooled_ref[...] += jnp.dot(pool_ref[...], h,
                                   preferred_element_type=jnp.float32)

        @pl.when(i == pl.num_programs(0) - 1)
        def _():
            o_ref[...] = (jnp.dot(pooled_ref[...], wc_ref[...],
                                  preferred_element_type=jnp.float32)
                          + bc_ref[...])


# --------------------------------------------------------------------- pallas wrappers

def _transform(x, w, tm, vmem_limit):
    n_pad, f_in = x.shape
    f_out = w.shape[1]
    return pl.pallas_call(
        _transform_kernel,
        out_shape=jax.ShapeDtypeStruct((n_pad, f_out), jnp.bfloat16),
        grid=(n_pad // tm,),
        in_specs=[pl.BlockSpec((tm, f_in), lambda i: (i, 0)),
                  pl.BlockSpec((f_in, f_out), lambda i: (0, 0))],
        out_specs=pl.BlockSpec((tm, f_out), lambda i: (i, 0)),
        compiler_params=pltpu.CompilerParams(
            dimension_semantics=("parallel",),
            vmem_limit_bytes=vmem_limit),
    )(x, w)


def _gcn_layer(adj, hw, b, w_next, tm, tk, hw_resident, vmem_limit):
    """HW_next = relu(Ahat @ HW + b) @ W_next (next layer's transform fused in)."""
    n_pad = adj.shape[0]
    h_pad = hw.shape[1]
    f_next = w_next.shape[1]
    n_row = n_pad // tm
    n_k = n_pad // tk

    if hw_resident:
        # Constant-index block -> DMA'd once for the whole kernel (no re-streaming).
        hw_spec = pl.BlockSpec((n_pad, h_pad), lambda i, k: (0, 0))
    else:
        # Fallback for huge graphs: stream HW per row tile (large tm keeps this cheap).
        hw_spec = pl.BlockSpec((tk, h_pad), lambda i, k: (k, 0))

    kernel = functools.partial(_gcn_layer_kernel, tk=tk, hw_resident=hw_resident)
    hw_reads = 1 if hw_resident else n_row
    cost = pl.CostEstimate(
        flops=2 * n_pad * n_pad * h_pad + 2 * n_pad * h_pad * f_next,
        transcendentals=0,
        bytes_accessed=(adj.size * adj.dtype.itemsize
                        + hw_reads * hw.size * hw.dtype.itemsize
                        + w_next.size * w_next.dtype.itemsize
                        + n_pad * f_next * 2),
    )
    return pl.pallas_call(
        kernel,
        out_shape=jax.ShapeDtypeStruct((n_pad, f_next), jnp.bfloat16),
        grid=(n_row, n_k),
        in_specs=[pl.BlockSpec((tm, tk), lambda i, k: (i, k)),
                  hw_spec,
                  pl.BlockSpec((1, h_pad), lambda i, k: (0, 0)),
                  pl.BlockSpec((h_pad, f_next), lambda i, k: (0, 0))],
        out_specs=pl.BlockSpec((tm, f_next), lambda i, k: (i, 0)),
        scratch_shapes=[pltpu.VMEM((tm, h_pad), jnp.float32)],
        compiler_params=pltpu.CompilerParams(
            dimension_semantics=("parallel", "arbitrary"),
            vmem_limit_bytes=vmem_limit),
        cost_estimate=cost,
    )(adj, hw, b, w_next)


def _gcn_final_pool_classify(adj, hw, b, pool, wc, bc, tm, tk, hw_resident, vmem_limit):
    """logits = mean_pool(relu(Ahat @ HW + b)) @ Wc + bc (pool + classifier fused)."""
    n_pad = adj.shape[0]
    h_pad = hw.shape[1]
    g_pad = pool.shape[0]
    c_pad = wc.shape[1]
    n_row = n_pad // tm
    n_k = n_pad // tk

    if hw_resident:
        hw_spec = pl.BlockSpec((n_pad, h_pad), lambda i, k: (0, 0))
    else:
        hw_spec = pl.BlockSpec((tk, h_pad), lambda i, k: (k, 0))

    kernel = functools.partial(_final_layer_kernel, tk=tk, hw_resident=hw_resident)
    hw_reads = 1 if hw_resident else n_row
    cost = pl.CostEstimate(
        flops=(2 * n_pad * n_pad * h_pad + 2 * g_pad * n_pad * h_pad
               + 2 * g_pad * h_pad * c_pad),
        transcendentals=0,
        bytes_accessed=(adj.size * adj.dtype.itemsize
                        + hw_reads * hw.size * hw.dtype.itemsize
                        + pool.size * pool.dtype.itemsize
                        + wc.size * wc.dtype.itemsize
                        + g_pad * c_pad * 4),
    )
    return pl.pallas_call(
        kernel,
        out_shape=jax.ShapeDtypeStruct((g_pad, c_pad), jnp.float32),
        grid=(n_row, n_k),
        in_specs=[pl.BlockSpec((tm, tk), lambda i, k: (i, k)),
                  hw_spec,
                  pl.BlockSpec((1, h_pad), lambda i, k: (0, 0)),
                  pl.BlockSpec((g_pad, tm), lambda i, k: (0, i)),
                  pl.BlockSpec((h_pad, c_pad), lambda i, k: (0, 0)),
                  pl.BlockSpec((1, c_pad), lambda i, k: (0, 0))],
        out_specs=pl.BlockSpec((g_pad, c_pad), lambda i, k: (0, 0)),
        scratch_shapes=[pltpu.VMEM((tm, h_pad), jnp.float32),
                        pltpu.VMEM((g_pad, h_pad), jnp.float32)],
        compiler_params=pltpu.CompilerParams(
            # The pooled accumulator carries across row tiles -> i must run sequentially.
            dimension_semantics=("arbitrary", "arbitrary"),
            vmem_limit_bytes=vmem_limit),
        cost_estimate=cost,
    )(adj, hw, b, pool, wc, bc)


# ----------------------------------------------------------------- graph preprocessing

def _build_normalized_adjacency_padded(edge_index, num_nodes, n_pad, dtype=jnp.bfloat16):
    """Dense Ahat = D^-1/2 (A + remaining self loops) D^-1/2 (PyG gcn_norm semantics),
    built directly at the padded shape with a single cast (padded rows/cols stay zero)."""
    src = edge_index[0].astype(jnp.int32)
    dst = edge_index[1].astype(jnp.int32)
    adj = jnp.zeros((n_pad, n_pad), jnp.float32)
    adj = adj.at[dst, src].add(1.0)          # messages flow source -> target
    node = jnp.arange(n_pad)
    diag = jnp.diagonal(adj)
    # add_remaining_self_loops: only where missing, and only for real nodes
    adj = adj + jnp.diag(jnp.where((diag == 0) & (node < num_nodes), 1.0, 0.0))
    deg = jnp.sum(adj, axis=1)
    dinv = jnp.where(deg > 0, jax.lax.rsqrt(deg), 0.0)
    return (adj * dinv[:, None] * dinv[None, :]).astype(dtype)


def _build_mean_pool_padded(batch, num_nodes, num_graphs, g_pad, n_pad):
    """P[g, n] = 1/|graph g| for real node n in graph g, else 0 (kept f32 - it is tiny)."""
    batch_p = jnp.full((n_pad,), -1, jnp.int32).at[:num_nodes].set(batch.astype(jnp.int32))
    onehot = (batch_p[None, :] == jnp.arange(g_pad)[:, None]).astype(jnp.float32)
    counts = jnp.maximum(jnp.sum(onehot, axis=1, keepdims=True), 1.0)
    return onehot / counts


def _pad2(a, rows, cols, dtype):
    out = jnp.zeros((rows, cols), dtype)
    return out.at[:a.shape[0], :a.shape[1]].set(a.astype(dtype))


# -------------------------------------------------------------------------- forward

def malware_gnn_forward(x, edge_index, batch, params, num_graphs, *,
                        force_hw_streaming=False):
    n_nodes, n_feat = x.shape
    hidden = params["w1"].shape[1]
    n_classes = params["wc"].shape[1]

    vmem_limit = _vmem_limit_bytes()

    # Node padding decoupled from tile size: pad to a 128 multiple, then pick tm/tk
    # that divide n_pad exactly (no partial tiles, no phantom O(n_pad^2) adj traffic).
    n_pad = _round_up(max(n_nodes, 1), _LANE)
    f_pad = _round_up(n_feat, _LANE)
    h_pad = _round_up(hidden, _LANE)
    c_pad = _round_up(n_classes, _LANE)
    g_pad = _round_up(num_graphs, 8)

    tm = _pick_tile(n_pad, min(_MAX_TM, max(_LANE, n_pad // 2)))   # keep >=2 row tiles
    tk = _pick_tile(n_pad, _MAX_TK)

    # Keep HW fully VMEM-resident inside aggregation whenever it fits comfortably
    # (double-buffered) in a fraction of the generation-aware VMEM budget.
    hw_bytes = n_pad * h_pad * 2
    hw_resident = (not force_hw_streaming) and (2 * hw_bytes <= vmem_limit // 4)

    adj = _build_normalized_adjacency_padded(edge_index, n_nodes, n_pad)     # bf16
    pool = _build_mean_pool_padded(batch, n_nodes, num_graphs, g_pad, n_pad)  # f32

    x_p = _pad2(x, n_pad, f_pad, jnp.bfloat16)
    w1 = _pad2(params["w1"], f_pad, h_pad, jnp.bfloat16)
    w2 = _pad2(params["w2"], h_pad, h_pad, jnp.bfloat16)
    w3 = _pad2(params["w3"], h_pad, h_pad, jnp.bfloat16)
    wc = _pad2(params["wc"], h_pad, c_pad, jnp.float32)
    b1 = _pad2(params["b1"].reshape(1, -1), 1, h_pad, jnp.float32)
    b2 = _pad2(params["b2"].reshape(1, -1), 1, h_pad, jnp.float32)
    b3 = _pad2(params["b3"].reshape(1, -1), 1, h_pad, jnp.float32)
    bc = _pad2(params["bc"].reshape(1, -1), 1, c_pad, jnp.float32)

    # Layer 1's transform is the only standalone one; layers 2-3's H @ W are fused
    # into the previous layer's aggregation epilogue, and the final layer also fuses
    # global_mean_pool + classifier (the layer-3 activation never touches HBM).
    hw = _transform(x_p, w1, tm, vmem_limit)                           # X @ W1
    hw = _gcn_layer(adj, hw, b1, w2, tm, tk, hw_resident, vmem_limit)  # relu(A@HW1+b1)@W2
    hw = _gcn_layer(adj, hw, b2, w3, tm, tk, hw_resident, vmem_limit)  # relu(A@HW2+b2)@W3
    logits = _gcn_final_pool_classify(adj, hw, b3, pool, wc, bc,
                                      tm, tk, hw_resident, vmem_limit)
    return logits[:num_graphs, :n_classes]


# ------------------------------------------------------------------------ reference

def _reference_forward(x, edge_index, batch, params, num_graphs):
    """Pure-JAX f32 reference with identical semantics (for validation)."""
    n = x.shape[0]
    adj = _build_normalized_adjacency_padded(edge_index, n, n, dtype=jnp.float32)
    pool = _build_mean_pool_padded(batch, n, num_graphs, num_graphs, n)
    h = x
    for wname, bname in (("w1", "b1"), ("w2", "b2"), ("w3", "b3")):
        h = jnp.maximum(adj @ (h @ params[wname]) + params[bname], 0.0)
    pooled = pool @ h
    return pooled @ params["wc"] + params["bc"]


def init_params(key, num_features, num_classes, hidden_dim):
    ks = jax.random.split(key, 8)

    def lin(k, shape):
        return jax.random.normal(k, shape, jnp.float32) / jnp.sqrt(jnp.float32(shape[0]))

    return {
        "w1": lin(ks[0], (num_features, hidden_dim)),
        "b1": jax.random.normal(ks[1], (hidden_dim,), jnp.float32) * 0.01,
        "w2": lin(ks[2], (hidden_dim, hidden_dim)),
        "b2": jax.random.normal(ks[3], (hidden_dim,), jnp.float32) * 0.01,
        "w3": lin(ks[4], (hidden_dim, hidden_dim)),
        "b3": jax.random.normal(ks[5], (hidden_dim,), jnp.float32) * 0.01,
        "wc": lin(ks[6], (hidden_dim, num_classes)),
        "bc": jax.random.normal(ks[7], (num_classes,), jnp.float32) * 0.01,
    }


if __name__ == "__main__":
    # Deterministic synthetic batch: 2 graphs x 160 nodes = 320 nodes
    # -> n_pad = 384, 3 row tiles (exercises the row-tile loop and pooled accumulation).
    num_graphs = 2
    nodes_per_graph = 160
    num_nodes = num_graphs * nodes_per_graph
    num_features = 16
    hidden_dim = 64          # module default
    num_classes = 5

    key = jax.random.PRNGKey(0)
    k_x, k_p = jax.random.split(key)

    x = jax.random.normal(k_x, (num_nodes, num_features), jnp.float32)

    # Ring edges within each graph (undirected => both directions).
    edges = []
    for g in range(num_graphs):
        base = g * nodes_per_graph
        for i in range(nodes_per_graph):
            a, b = base + i, base + (i + 1) % nodes_per_graph
            edges.append((a, b))
            edges.append((b, a))
    edge_index = jnp.array(edges, dtype=jnp.int32).T                     # [2, E]
    batch = jnp.repeat(jnp.arange(num_graphs, dtype=jnp.int32), nodes_per_graph)

    params = init_params(k_p, num_features, num_classes, hidden_dim)

    fwd = jax.jit(malware_gnn_forward,
                  static_argnames=("num_graphs", "force_hw_streaming"))

    out = jax.block_until_ready(fwd(x, edge_index, batch, params, num_graphs=num_graphs))
    assert out.shape == (num_graphs, num_classes)

    # Also exercise the HW-streaming fallback path (used when HW exceeds the VMEM budget).
    out_stream = jax.block_until_ready(
        fwd(x, edge_index, batch, params, num_graphs=num_graphs, force_hw_streaming=True))

    ref = _reference_forward(x, edge_index, batch, params, num_graphs)
    np.testing.assert_allclose(np.asarray(out), np.asarray(ref), rtol=5e-2, atol=5e-2)
    np.testing.assert_allclose(np.asarray(out_stream), np.asarray(ref), rtol=5e-2, atol=5e-2)

    print("KERNEL_OK")
</pallas_src>

<mosaic_0001>
module attributes {stable_mosaic.version = 11 : i64} {
  func.func @_transform_kernel(%arg0: i32, %arg1: memref<128x128xbf16, #tpu.memory_space<vmem>>, %arg2: memref<128x128xbf16, #tpu.memory_space<vmem>>, %arg3: memref<128x128xbf16, #tpu.memory_space<vmem>>) attributes {dimension_semantics = [#tpu.dimension_semantics<parallel>], iteration_bounds = array<i64: 3>, scalar_prefetch = 0 : i64, scratch_operands = 0 : i64, tpu.core_type = #tpu.core_type<tc>, window_params = [{transform_indices = @transform_0, window_bounds = array<i64: 128, 128>}, {pipeline_mode = #tpu.pipeline_mode<synchronous>, transform_indices = @transform_1, window_bounds = array<i64: 128, 128>}, {transform_indices = @transform_2, window_bounds = array<i64: 128, 128>}]} {
    %c0 = arith.constant 0 : index
    %c0_0 = arith.constant 0 : index
    %0 = vector.load %arg1[%c0, %c0_0] : memref<128x128xbf16, #tpu.memory_space<vmem>>, vector<128x128xbf16>
    %c0_1 = arith.constant 0 : index
    %c0_2 = arith.constant 0 : index
    %1 = vector.load %arg2[%c0_1, %c0_2] : memref<128x128xbf16, #tpu.memory_space<vmem>>, vector<128x128xbf16>
    %cst = arith.constant dense<0.000000e+00> : vector<128x128xf32>
    %2 = tpu.matmul %0, %1, %cst {dimension_numbers = #tpu.dot_dimension_numbers<[1], [0], [0], [1], [0, 0, 1, 1], [], []>} : vector<128x128xbf16>, vector<128x128xbf16>, vector<128x128xf32> -> vector<128x128xf32>
    %3 = arith.truncf %2 : vector<128x128xf32> to vector<128x128xbf16>
    %c0_3 = arith.constant 0 : index
    %c0_4 = arith.constant 0 : index
    %4 = vector.load %arg3[%c0_3, %c0_4] : memref<128x128xbf16, #tpu.memory_space<vmem>>, vector<128x128xbf16>
    tpu.vector_store %arg3[%c0_3, %c0_4], %3 {strides = array<i32>} : memref<128x128xbf16, #tpu.memory_space<vmem>>, vector<128x128xbf16>,
    return
  }
  func.func @transform_0(%arg0: i32) -> (i32, i32) {
    %c0_i32 = arith.constant 0 : i32
    %c0_i32_0 = arith.constant 0 : i32
    return %arg0, %c0_i32 : i32, i32
  }
  func.func @transform_1(%arg0: i32) -> (i32, i32) {
    %c0_i32 = arith.constant 0 : i32
    %c0_i32_0 = arith.constant 0 : i32
    %c0_i32_1 = arith.constant 0 : i32
    return %c0_i32, %c0_i32_0 : i32, i32
  }
  func.func @transform_2(%arg0: i32) -> (i32, i32) {
    %c0_i32 = arith.constant 0 : i32
    %c0_i32_0 = arith.constant 0 : i32
    return %arg0, %c0_i32 : i32, i32
  }
}

module attributes {stable_mosaic.version = 11 : i64} {
  func.func @_gcn_layer_kernel(%arg0: i32, %arg1: i32, %arg2: memref<128x384xbf16, #tpu.memory_space<vmem>>, %arg3: memref<384x128xbf16, #tpu.memory_space<vmem>>, %arg4: memref<1x128xf32, #tpu.memory_space<vmem>>, %arg5: memref<128x128xbf16, #tpu.memory_space<vmem>>, %arg6: memref<128x128xbf16, #tpu.memory_space<vmem>>, %arg7: memref<128x128xf32, #tpu.memory_space<vmem>>) attributes {dimension_semantics = [#tpu.dimension_semantics<parallel>, #tpu.dimension_semantics<arbitrary>], iteration_bounds = array<i64: 3, 1>, scalar_prefetch = 0 : i64, scratch_operands = 1 : i64, tpu.core_type = #tpu.core_type<tc>, window_params = [{transform_indices = @transform_0, window_bounds = array<i64: 128, 384>}, {pipeline_mode = #tpu.pipeline_mode<synchronous>, transform_indices = @transform_1, window_bounds = array<i64: 384, 128>}, {pipeline_mode = #tpu.pipeline_mode<synchronous>, transform_indices = @transform_2, window_bounds = array<i64: 1, 128>}, {pipeline_mode = #tpu.pipeline_mode<synchronous>, transform_indices = @transform_3, window_bounds = array<i64: 128, 128>}, {transform_indices = @transform_4, window_bounds = array<i64: 128, 128>}]} {
    %c0_i32 = arith.constant 0 : i32
    %0 = arith.cmpi eq, %arg1, %c0_i32 : i32
    %1 = arith.extui %0 : i1 to i32
    %c0_i32_0 = arith.constant 0 : i32
    %2 = arith.cmpi ne, %1, %c0_i32_0 : i32
    scf.if %2 {
      %cst_9 = arith.constant 0.000000e+00 : f32
      %15 = vector.broadcast %cst_9 : f32 to vector<128x128xf32>
      %c0_10 = arith.constant 0 : index
      %c0_11 = arith.constant 0 : index
      %16 = vector.load %arg7[%c0_10, %c0_11] : memref<128x128xf32, #tpu.memory_space<vmem>>, vector<128x128xf32>
      tpu.vector_store %arg7[%c0_10, %c0_11], %15 {strides = array<i32>} : memref<128x128xf32, #tpu.memory_space<vmem>>, vector<128x128xf32>,
    } else {
    }
    %c384_i32 = arith.constant 384 : i32
    %3 = arith.muli %arg1, %c384_i32 : i32
    %4 = tpu.assume_multiple %3, 128 : i32
    %5 = arith.index_cast %4 : i32 to index
    %c0 = arith.constant 0 : index
    %6 = vector.load %arg3[%5, %c0] : memref<384x128xbf16, #tpu.memory_space<vmem>>, vector<384x128xbf16>
    %c0_1 = arith.constant 0 : index
    %c0_2 = arith.constant 0 : index
    %7 = vector.load %arg7[%c0_1, %c0_2] : memref<128x128xf32, #tpu.memory_space<vmem>>, vector<128x128xf32>
    %c0_3 = arith.constant 0 : index
    %c0_4 = arith.constant 0 : index
    %8 = vector.load %arg2[%c0_3, %c0_4] : memref<128x384xbf16, #tpu.memory_space<vmem>>, vector<128x384xbf16>
    %cst = arith.constant dense<0.000000e+00> : vector<128x128xf32>
    %9 = tpu.matmul %8, %6, %cst {dimension_numbers = #tpu.dot_dimension_numbers<[1], [0], [0], [1], [0, 0, 1, 1], [], []>} : vector<128x384xbf16>, vector<384x128xbf16>, vector<128x128xf32> -> vector<128x128xf32>
    %10 = arith.addf %7, %9 : vector<128x128xf32>
    %c0_5 = arith.constant 0 : index
    %c0_6 = arith.constant 0 : index
    %11 = vector.load %arg7[%c0_5, %c0_6] : memref<128x128xf32, #tpu.memory_space<vmem>>, vector<128x128xf32>
    tpu.vector_store %arg7[%c0_5, %c0_6], %10 {strides = array<i32>} : memref<128x128xf32, #tpu.memory_space<vmem>>, vector<128x128xf32>,
    %c0_i32_7 = arith.constant 0 : i32
    %12 = arith.cmpi eq, %arg1, %c0_i32_7 : i32
    %13 = arith.extui %12 : i1 to i32
    %c0_i32_8 = arith.constant 0 : i32
    %14 = arith.cmpi ne, %13, %c0_i32_8 : i32
    scf.if %14 {
      %c0_9 = arith.constant 0 : index
      %c0_10 = arith.constant 0 : index
      %15 = vector.load %arg7[%c0_9, %c0_10] : memref<128x128xf32, #tpu.memory_space<vmem>>, vector<128x128xf32>
      %c0_11 = arith.constant 0 : index
      %c0_12 = arith.constant 0 : index
      %16 = vector.load %arg4[%c0_11, %c0_12] : memref<1x128xf32, #tpu.memory_space<vmem>>, vector<1x128xf32>
      %17 = vector.broadcast %16 : vector<1x128xf32> to vector<128x128xf32>
      %18 = arith.addf %15, %17 : vector<128x128xf32>
      %cst_13 = arith.constant 0.000000e+00 : f32
      %19 = vector.broadcast %cst_13 : f32 to vector<128x128xf32>
      %20 = arith.maximumf %18, %19 : vector<128x128xf32>
      %21 = arith.truncf %20 : vector<128x128xf32> to vector<128x128xbf16>
      %c0_14 = arith.constant 0 : index
      %c0_15 = arith.constant 0 : index
      %22 = vector.load %arg5[%c0_14, %c0_15] : memref<128x128xbf16, #tpu.memory_space<vmem>>, vector<128x128xbf16>
      %cst_16 = arith.constant dense<0.000000e+00> : vector<128x128xf32>
      %23 = tpu.matmul %21, %22, %cst_16 {dimension_numbers = #tpu.dot_dimension_numbers<[1], [0], [0], [1], [0, 0, 1, 1], [], []>} : vector<128x128xbf16>, vector<128x128xbf16>, vector<128x128xf32> -> vector<128x128xf32>
      %24 = arith.truncf %23 : vector<128x128xf32> to vector<128x128xbf16>
      %c0_17 = arith.constant 0 : index
      %c0_18 = arith.constant 0 : index
      %25 = vector.load %arg6[%c0_17, %c0_18] : memref<128x128xbf16, #tpu.memory_space<vmem>>, vector<128x128xbf16>
      tpu.vector_store %arg6[%c0_17, %c0_18], %24 {strides = array<i32>} : memref<128x128xbf16, #tpu.memory_space<vmem>>, vector<128x128xbf16>,
    } else {
    }
    return
  }
  func.func @transform_0(%arg0: i32, %arg1: i32) -> (i32, i32) {
    %c0_i32 = arith.constant 0 : i32
    return %arg0, %arg1 : i32, i32
  }
  func.func @transform_1(%arg0: i32, %arg1: i32) -> (i32, i32) {
    %c0_i32 = arith.constant 0 : i32
    %c0_i32_0 = arith.constant 0 : i32
    %c0_i32_1 = arith.constant 0 : i32
    return %c0_i32, %c0_i32_0 : i32, i32
  }
  func.func @transform_2(%arg0: i32, %arg1: i32) -> (i32, i32) {
    %c0_i32 = arith.constant 0 : i32
    %c0_i32_0 = arith.constant 0 : i32
    %c0_i32_1 = arith.constant 0 : i32
    return %c0_i32, %c0_i32_0 : i32, i32
  }
  func.func @transform_3(%arg0: i32, %arg1: i32) -> (i32, i32) {
    %c0_i32 = arith.constant 0 : i32
    %c0_i32_0 = arith.constant 0 : i32
    %c0_i32_1 = arith.constant 0 : i32
    return %c0_i32, %c0_i32_0 : i32, i32
  }
  func.func @transform_4(%arg0: i32, %arg1: i32) -> (i32, i32) {
    %c0_i32 = arith.constant 0 : i32
    %c0_i32_0 = arith.constant 0 : i32
    return %arg0, %c0_i32 : i32, i32
  }
}

module attributes {stable_mosaic.version = 11 : i64} {
  func.func @_final_layer_kernel(%arg0: i32, %arg1: i32, %arg2: memref<128x384xbf16, #tpu.memory_space<vmem>>, %arg3: memref<384x128xbf16, #tpu.memory_space<vmem>>, %arg4: memref<1x128xf32, #tpu.memory_space<vmem>>, %arg5: memref<8x128xf32, #tpu.memory_space<vmem>>, %arg6: memref<128x128xf32, #tpu.memory_space<vmem>>, %arg7: memref<1x128xf32, #tpu.memory_space<vmem>>, %arg8: memref<8x128xf32, #tpu.memory_space<vmem>>, %arg9: memref<128x128xf32, #tpu.memory_space<vmem>>, %arg10: memref<8x128xf32, #tpu.memory_space<vmem>>) attributes {dimension_semantics = [#tpu.dimension_semantics<arbitrary>, #tpu.dimension_semantics<arbitrary>], iteration_bounds = array<i64: 3, 1>, scalar_prefetch = 0 : i64, scratch_operands = 2 : i64, tpu.core_type = #tpu.core_type<tc>, window_params = [{transform_indices = @transform_0, window_bounds = array<i64: 128, 384>}, {pipeline_mode = #tpu.pipeline_mode<synchronous>, transform_indices = @transform_1, window_bounds = array<i64: 384, 128>}, {pipeline_mode = #tpu.pipeline_mode<synchronous>, transform_indices = @transform_2, window_bounds = array<i64: 1, 128>}, {transform_indices = @transform_3, window_bounds = array<i64: 8, 128>}, {pipeline_mode = #tpu.pipeline_mode<synchronous>, transform_indices = @transform_4, window_bounds = array<i64: 128, 128>}, {pipeline_mode = #tpu.pipeline_mode<synchronous>, transform_indices = @transform_5, window_bounds = array<i64: 1, 128>}, {pipeline_mode = #tpu.pipeline_mode<synchronous>, transform_indices = @transform_6, window_bounds = array<i64: 8, 128>}]} {
    %c0_i32 = arith.constant 0 : i32
    %0 = arith.cmpi eq, %arg0, %c0_i32 : i32
    %c0_i32_0 = arith.constant 0 : i32
    %1 = arith.cmpi eq, %arg1, %c0_i32_0 : i32
    %2 = arith.andi %0, %1 : i1
    %3 = arith.extui %2 : i1 to i32
    %c0_i32_1 = arith.constant 0 : i32
    %4 = arith.cmpi ne, %3, %c0_i32_1 : i32
    scf.if %4 {
      %cst_12 = arith.constant 0.000000e+00 : f32
      %20 = vector.broadcast %cst_12 : f32 to vector<8x128xf32>
      %c0_13 = arith.constant 0 : index
      %c0_14 = arith.constant 0 : index
      %21 = vector.load %arg10[%c0_13, %c0_14] : memref<8x128xf32, #tpu.memory_space<vmem>>, vector<8x128xf32>
      tpu.vector_store %arg10[%c0_13, %c0_14], %20 {strides = array<i32>} : memref<8x128xf32, #tpu.memory_space<vmem>>, vector<8x128xf32>,
    } else {
    }
    %c0_i32_2 = arith.constant 0 : i32
    %5 = arith.cmpi eq, %arg1, %c0_i32_2 : i32
    %6 = arith.extui %5 : i1 to i32
    %c0_i32_3 = arith.constant 0 : i32
    %7 = arith.cmpi ne, %6, %c0_i32_3 : i32
    scf.if %7 {
      %cst_12 = arith.constant 0.000000e+00 : f32
      %20 = vector.broadcast %cst_12 : f32 to vector<128x128xf32>
      %c0_13 = arith.constant 0 : index
      %c0_14 = arith.constant 0 : index
      %21 = vector.load %arg9[%c0_13, %c0_14] : memref<128x128xf32, #tpu.memory_space<vmem>>, vector<128x128xf32>
      tpu.vector_store %arg9[%c0_13, %c0_14], %20 {strides = array<i32>} : memref<128x128xf32, #tpu.memory_space<vmem>>, vector<128x128xf32>,
    } else {
    }
    %c384_i32 = arith.constant 384 : i32
    %8 = arith.muli %arg1, %c384_i32 : i32
    %9 = tpu.assume_multiple %8, 128 : i32
    %10 = arith.index_cast %9 : i32 to index
    %c0 = arith.constant 0 : index
    %11 = vector.load %arg3[%10, %c0] : memref<384x128xbf16, #tpu.memory_space<vmem>>, vector<384x128xbf16>
    %c0_4 = arith.constant 0 : index
    %c0_5 = arith.constant 0 : index
    %12 = vector.load %arg9[%c0_4, %c0_5] : memref<128x128xf32, #tpu.memory_space<vmem>>, vector<128x128xf32>
    %c0_6 = arith.constant 0 : index
    %c0_7 = arith.constant 0 : index
    %13 = vector.load %arg2[%c0_6, %c0_7] : memref<128x384xbf16, #tpu.memory_space<vmem>>, vector<128x384xbf16>
    %cst = arith.constant dense<0.000000e+00> : vector<128x128xf32>
    %14 = tpu.matmul %13, %11, %cst {dimension_numbers = #tpu.dot_dimension_numbers<[1], [0], [0], [1], [0, 0, 1, 1], [], []>} : vector<128x384xbf16>, vector<384x128xbf16>, vector<128x128xf32> -> vector<128x128xf32>
    %15 = arith.addf %12, %14 : vector<128x128xf32>
    %c0_8 = arith.constant 0 : index
    %c0_9 = arith.constant 0 : index
    %16 = vector.load %arg9[%c0_8, %c0_9] : memref<128x128xf32, #tpu.memory_space<vmem>>, vector<128x128xf32>
    tpu.vector_store %arg9[%c0_8, %c0_9], %15 {strides = array<i32>} : memref<128x128xf32, #tpu.memory_space<vmem>>, vector<128x128xf32>,
    %c0_i32_10 = arith.constant 0 : i32
    %17 = arith.cmpi eq, %arg1, %c0_i32_10 : i32
    %18 = arith.extui %17 : i1 to i32
    %c0_i32_11 = arith.constant 0 : i32
    %19 = arith.cmpi ne, %18, %c0_i32_11 : i32
    scf.if %19 {
      %c0_12 = arith.constant 0 : index
      %c0_13 = arith.constant 0 : index
      %20 = vector.load %arg9[%c0_12, %c0_13] : memref<128x128xf32, #tpu.memory_space<vmem>>, vector<128x128xf32>
      %c0_14 = arith.constant 0 : index
      %c0_15 = arith.constant 0 : index
      %21 = vector.load %arg4[%c0_14, %c0_15] : memref<1x128xf32, #tpu.memory_space<vmem>>, vector<1x128xf32>
      %22 = vector.broadcast %21 : vector<1x128xf32> to vector<128x128xf32>
      %23 = arith.addf %20, %22 : vector<128x128xf32>
      %cst_16 = arith.constant 0.000000e+00 : f32
      %24 = vector.broadcast %cst_16 : f32 to vector<128x128xf32>
      %25 = arith.maximumf %23, %24 : vector<128x128xf32>
      %c0_17 = arith.constant 0 : index
      %c0_18 = arith.constant 0 : index
      %26 = vector.load %arg10[%c0_17, %c0_18] : memref<8x128xf32, #tpu.memory_space<vmem>>, vector<8x128xf32>
      %c0_19 = arith.constant 0 : index
      %c0_20 = arith.constant 0 : index
      %27 = vector.load %arg5[%c0_19, %c0_20] : memref<8x128xf32, #tpu.memory_space<vmem>>, vector<8x128xf32>
      %cst_21 = arith.constant dense<0.000000e+00> : vector<8x128xf32>
      %28 = tpu.matmul %27, %25, %cst_21 {dimension_numbers = #tpu.dot_dimension_numbers<[1], [0], [0], [1], [0, 0, 1, 1], [], []>} : vector<8x128xf32>, vector<128x128xf32>, vector<8x128xf32> -> vector<8x128xf32>
      %29 = arith.addf %26, %28 : vector<8x128xf32>
      %c0_22 = arith.constant 0 : index
      %c0_23 = arith.constant 0 : index
      %30 = vector.load %arg10[%c0_22, %c0_23] : memref<8x128xf32, #tpu.memory_space<vmem>>, vector<8x128xf32>
      tpu.vector_store %arg10[%c0_22, %c0_23], %29 {strides = array<i32>} : memref<8x128xf32, #tpu.memory_space<vmem>>, vector<8x128xf32>,
      %c2_i32 = arith.constant 2 : i32
      %31 = arith.cmpi eq, %arg0, %c2_i32 : i32
      %32 = arith.extui %31 : i1 to i32
      %c0_i32_24 = arith.constant 0 : i32
      %33 = arith.cmpi ne, %32, %c0_i32_24 : i32
      scf.if %33 {
        %c0_25 = arith.constant 0 : index
        %c0_26 = arith.constant 0 : index
        %34 = vector.load %arg10[%c0_25, %c0_26] : memref<8x128xf32, #tpu.memory_space<vmem>>, vector<8x128xf32>
        %c0_27 = arith.constant 0 : index
        %c0_28 = arith.constant 0 : index
        %35 = vector.load %arg6[%c0_27, %c0_28] : memref<128x128xf32, #tpu.memory_space<vmem>>, vector<128x128xf32>
        %cst_29 = arith.constant dense<0.000000e+00> : vector<8x128xf32>
        %36 = tpu.matmul %34, %35, %cst_29 {dimension_numbers = #tpu.dot_dimension_numbers<[1], [0], [0], [1], [0, 0, 1, 1], [], []>} : vector<8x128xf32>, vector<128x128xf32>, vector<8x128xf32> -> vector<8x128xf32>
        %c0_30 = arith.constant 0 : index
        %c0_31 = arith.constant 0 : index
        %37 = vector.load %arg7[%c0_30, %c0_31] : memref<1x128xf32, #tpu.memory_space<vmem>>, vector<1x128xf32>
        %38 = vector.broadcast %37 : vector<1x128xf32> to vector<8x128xf32>
        %39 = arith.addf %36, %38 : vector<8x128xf32>
        %c0_32 = arith.constant 0 : index
        %c0_33 = arith.constant 0 : index
        %40 = vector.load %arg8[%c0_32, %c0_33] : memref<8x128xf32, #tpu.memory_space<vmem>>, vector<8x128xf32>
        tpu.vector_store %arg8[%c0_32, %c0_33], %39 {strides = array<i32>} : memref<8x128xf32, #tpu.memory_space<vmem>>, vector<8x128xf32>,
      } else {
      }
    } else {
    }
    return
  }
  func.func @transform_0(%arg0: i32, %arg1: i32) -> (i32, i32) {
    %c0_i32 = arith.constant 0 : i32
    return %arg0, %arg1 : i32, i32
  }
  func.func @transform_1(%arg0: i32, %arg1: i32) -> (i32, i32) {
    %c0_i32 = arith.constant 0 : i32
    %c0_i32_0 = arith.constant 0 : i32
    %c0_i32_1 = arith.constant 0 : i32
    return %c0_i32, %c0_i32_0 : i32, i32
  }
  func.func @transform_2(%arg0: i32, %arg1: i32) -> (i32, i32) {
    %c0_i32 = arith.constant 0 : i32
    %c0_i32_0 = arith.constant 0 : i32
    %c0_i32_1 = arith.constant 0 : i32
    return %c0_i32, %c0_i32_0 : i32, i32
  }
  func.func @transform_3(%arg0: i32, %arg1: i32) -> (i32, i32) {
    %c0_i32 = arith.constant 0 : i32
    %c0_i32_0 = arith.constant 0 : i32
    return %c0_i32, %arg0 : i32, i32
  }
  func.func @transform_4(%arg0: i32, %arg1: i32) -> (i32, i32) {
    %c0_i32 = arith.constant 0 : i32
    %c0_i32_0 = arith.constant 0 : i32
    %c0_i32_1 = arith.constant 0 : i32
    return %c0_i32, %c0_i32_0 : i32, i32
  }
  func.func @transform_5(%arg0: i32, %arg1: i32) -> (i32, i32) {
    %c0_i32 = arith.constant 0 : i32
    %c0_i32_0 = arith.constant 0 : i32
    %c0_i32_1 = arith.constant 0 : i32
    return %c0_i32, %c0_i32_0 : i32, i32
  }
  func.func @transform_6(%arg0: i32, %arg1: i32) -> (i32, i32) {
    %c0_i32 = arith.constant 0 : i32
    %c0_i32_0 = arith.constant 0 : i32
    %c0_i32_1 = arith.constant 0 : i32
    return %c0_i32, %c0_i32_0 : i32, i32
  }
}

</mosaic_0001>

<bundles_post_ra>
// kernel: malware_gnn_forward.4
= control target key start
LH: loop header
LB: loop body
LE: loop exit
PB: predicated region body
PF: predicated region fallthrough
CT: control target
= control target key end

     0   :  { %s605_s9 = smov 0   ;;  %s653_s0 = inlined_call_operand.vmem [shape: bf16[384,128], index: 0, kind: input, shape index: {}]   ;;  %s654_s1 = inlined_call_operand.vmem [shape: bf16[128,128], index: 1, kind: input, shape index: {}]   ;;  %s655_s2 = inlined_call_operand.vmem [shape: bf16[384,128], index: 2, kind: output, shape index: {}]  }
   0x1 LB: > { %s412_s10 = sadd.s32 4294967295, %s588_s9   ;;  %p416_p0 = scmp.ge.s32.totalorder %s588_s9, 1  ;;  %s588_s9 = sphi %s605_s9, %s12_s9  }
   0x2   : > { %p113_p1 = scmp.lt.s32.totalorder %s588_s9, 4 }
   0x4   : > { %p114_p2 = pnand %p416_p0, %p113_p1 }
   0x5   : > { %s417_s19 = sshll.u32 (!%p114_p2), %s412_s10, 4 }
   0x6   : > { %117 = sbr.rel (%p114_p2) target bundleno = 204 (0xcc), region = 28  ;;  %p136_p3 = scmp.lt.s32.totalorder (!%p114_p2), %s417_s19, 47 }
   0xb   : > { %v502_v0 = vld [vmem:[%s654_s1 + $0x38] sm:$0xff]  ;;  %v501_v1 = vld [vmem:[%s654_s1 + $0x30] sm:$0xff]  ;;  %v500_v2 = vld [vmem:[%s654_s1 + $0x28] sm:$0xff]  ;;  %s657_s19 = smov (!%p136_p3, %s417_s19), 47 }
   0xc   : > { %275 = vmatpush.bf16.msra.mxu0 %v502_v0  ;;  %550 = vmatpush.bf16.msra.mxu1 %v502_v0  ;;  %v499_v3 = vld [vmem:[%s654_s1 + $0x20] sm:$0xff]  ;;  %v498_v4 = vld [vmem:[%s654_s1 + $0x18] sm:$0xff]  ;;  %v497_v5 = vld [vmem:[%s654_s1 + $0x10] sm:$0xff]  ;;  %s418_s26 = sshll.u32 %s657_s19, 2 }
   0xd   : > { %551 = vmatpush.bf16.msra.mxu2 %v502_v0  ;;  %552 = vmatpush.bf16.msra.mxu3 %v502_v0  ;;  %v496_v6 = vld [vmem:[%s654_s1 + $0x8] sm:$0xff]  ;;  %v495_v7 = vld [vmem:[%s654_s1] sm:$0xff]  ;;  %s139_s3 = scalar_lea.vmem %s653_s0, %s418_s26  ;;  %s145_s6 = scalar_lea.vmem %s655_s2, %s418_s26 }
   0xe   : > { %v487_v8 = vld [vmem:[%s139_s3] sm:$0xff]  ;;  %v489_v9 = vld [vmem:[%s139_s3 + $0x10] sm:$0xff]  ;;  %v488_v12 = vld [vmem:[%s139_s3 + $0x8] sm:$0xff] }
   0xf   : > { %v491_v10 = vld [vmem:[%s139_s3 + $0x20] sm:$0xff]  ;;  %v493_v11 = vld [vmem:[%s139_s3 + $0x30] sm:$0xff]  ;;  %v490_v13 = vld [vmem:[%s139_s3 + $0x18] sm:$0xff] }
  0x10   : > { %276 = vmatpush.bf16.msra.mxu0 %v501_v1  ;;  %553 = vmatpush.bf16.msra.mxu1 %v501_v1  ;;  %v492_v14 = vld [vmem:[%s139_s3 + $0x28] sm:$0xff]  ;;  %v494_v15 = vld [vmem:[%s139_s3 + $0x38] sm:$0xff] }
  0x11   : > { %554 = vmatpush.bf16.msra.mxu2 %v501_v1  ;;  %555 = vmatpush.bf16.msra.mxu3 %v501_v1 }
  0x14   : > { %277 = vmatpush.bf16.msra.mxu0 %v500_v2  ;;  %556 = vmatpush.bf16.msra.mxu1 %v500_v2 }
  0x15   : > { %557 = vmatpush.bf16.msra.mxu2 %v500_v2  ;;  %558 = vmatpush.bf16.msra.mxu3 %v500_v2 }
  0x18   : > { %278 = vmatpush.bf16.msra.mxu0 %v499_v3  ;;  %559 = vmatpush.bf16.msra.mxu1 %v499_v3 }
  0x19   : > { %560 = vmatpush.bf16.msra.mxu2 %v499_v3  ;;  %561 = vmatpush.bf16.msra.mxu3 %v499_v3 }
  0x1c   : > { %279 = vmatpush.bf16.msra.mxu0 %v498_v4  ;;  %562 = vmatpush.bf16.msra.mxu1 %v498_v4 }
  0x1d   : > { %563 = vmatpush.bf16.msra.mxu2 %v498_v4  ;;  %564 = vmatpush.bf16.msra.mxu3 %v498_v4 }
  0x20   : > { %280 = vmatpush.bf16.msra.mxu0 %v497_v5  ;;  %565 = vmatpush.bf16.msra.mxu1 %v497_v5 }
  0x21   : > { %566 = vmatpush.bf16.msra.mxu2 %v497_v5  ;;  %567 = vmatpush.bf16.msra.mxu3 %v497_v5 }
  0x24   : > { %281 = vmatpush.bf16.msra.mxu0 %v496_v6  ;;  %568 = vmatpush.bf16.msra.mxu1 %v496_v6 }
  0x25   : > { %569 = vmatpush.bf16.msra.mxu2 %v496_v6  ;;  %570 = vmatpush.bf16.msra.mxu3 %v496_v6 }
  0x28   : > { %282 = vmatpush.bf16.msra.mxu0 %v495_v7  ;;  %571 = vmatpush.bf16.msra.mxu1 %v495_v7 }
  0x29   : > { %572 = vmatpush.bf16.msra.mxu2 %v495_v7  ;;  %573 = vmatpush.bf16.msra.mxu3 %v495_v7 }
  0x2b   : > { %283 = vmatmul.bf16.vlgmr.msra.gmra.mxu0 %v487_v8  ;;  %293 = vmatmul.bf16.vlgmr.msra.gmra.mxu1 %v489_v9 }
  0x2c   : > { %303 = vmatmul.bf16.vlgmr.msra.gmra.mxu2 %v491_v10  ;;  %313 = vmatmul.bf16.vlgmr.msra.gmra.mxu3 %v493_v11 }
  0x3b   : > { %288 = vmatmul.bf16.gmra.mxu0 %v488_v12  ;;  %298 = vmatmul.bf16.gmra.mxu1 %v490_v13 }
  0x3c   : > { %308 = vmatmul.bf16.gmra.mxu2 %v492_v14  ;;  %318 = vmatmul.bf16.gmra.mxu3 %v494_v15 }
  0xa8   : > { %v284_v16 = vpop.f32.mrf.mxu0  ;;  %v294_v17 = vpop.f32.mrf.mxu1 }
  0xaf   : > { %v304_v18 = vpop.f32.mrf.mxu2  ;;  %v314_v19 = vpop.f32.mrf.mxu3 }
  0xb0   : > { %v286_v20 = vpop.f32.mrf.mxu0  ;;  %v296_v21 = vpop.f32.mrf.mxu1 }
  0xb1   : > { %v506_v22 = vpack.c.bf16 %v286_v20, %v284_v16  ;;  %v516_v23 = vpack.c.bf16 %v296_v21, %v294_v17 }
  0xb3   : > { %507 = vst [vmem:[%s145_s6] sm:$0xff] %v506_v22  }
  0xb4   : > { %544 = vst [vmem:[%s145_s6 + $0x10] sm:$0xff] %v516_v23  }
  0xb7   : > { %v306_v24 = vpop.f32.mrf.mxu2  ;;  %v316_v25 = vpop.f32.mrf.mxu3 }
  0xb8   : > { %v526_v26 = vpack.c.bf16 %v306_v24, %v304_v18  ;;  %v536_v27 = vpack.c.bf16 %v316_v25, %v314_v19  ;;  %v289_v28 = vpop.f32.mrf.mxu0  ;;  %v299_v29 = vpop.f32.mrf.mxu1 }
  0xba   : > { %546 = vst [vmem:[%s145_s6 + $0x20] sm:$0xff] %v526_v26  }
  0xbb   : > { %548 = vst [vmem:[%s145_s6 + $0x30] sm:$0xff] %v536_v27  }
  0xbf   : > { %v309_v30 = vpop.f32.mrf.mxu2  ;;  %v319_v31 = vpop.f32.mrf.mxu3 }
  0xc0   : > { %v291_v32 = vpop.f32.mrf.mxu0  ;;  %v301_v33 = vpop.f32.mrf.mxu1 }
  0xc1   : > { %v511_v34 = vpack.c.bf16 %v291_v32, %v289_v28  ;;  %v521_v35 = vpack.c.bf16 %v301_v33, %v299_v29 }
  0xc3   : > { %543 = vst [vmem:[%s145_s6 + $0x8] sm:$0xff] %v511_v34  }
  0xc4   : > { %545 = vst [vmem:[%s145_s6 + $0x18] sm:$0xff] %v521_v35  }
  0xc7   : > { %v311_v36 = vpop.f32.mrf.mxu2  ;;  %v321_v37 = vpop.f32.mrf.mxu3 }
  0xc8   : > { %v531_v38 = vpack.c.bf16 %v311_v36, %v309_v30  ;;  %v541_v39 = vpack.c.bf16 %v321_v37, %v319_v31 }
  0xca   : > { %547 = vst [vmem:[%s145_s6 + $0x28] sm:$0xff] %v531_v38  }
  0xcb   : > { %549 = vst [vmem:[%s145_s6 + $0x38] sm:$0xff] %v541_v39  }
  0xcc PF: > { %s12_s9 = sadd.s32 1, %s588_s9  }
  0xcd   : > { %p9_p4 = scmp.ge.s32.totalorder %s12_s9, 5  }
  0xcf   :  { %11 = sbr.rel (!%p9_p4) target bundleno = 1 (0x1), region = 58 }

// kernel: malware_gnn_forward.5
= control target key start
LH: loop header
LB: loop body
LE: loop exit
PB: predicated region body
PF: predicated region fallthrough
CT: control target
= control target key end

     0   :  { %s1498_s15 = smov 0   ;;  %s1500_s16 = smov 0   ;;  %s1715_s0 = inlined_call_operand.vmem [shape: bf16[384,384], index: 0, kind: input, shape index: {}]   ;;  %s1716_s1 = inlined_call_operand.vmem [shape: bf16[384,128], index: 1, kind: input, shape index: {}]   ;;  %s1717_s2 = inlined_call_operand.vmem [shape: f32[1,128], index: 2, kind: input, shape index: {}]   ;;  %s1718_s3 = inlined_call_operand.vmem [shape: bf16[128,128], index: 3, kind: input, shape index: {}]   ;;  %s1719_s4 = inlined_call_operand.vmem [shape: bf16[384,128], index: 4, kind: output, shape index: {}]  }
   0x1   :  { %s1502_s17 = smov 0  }
   0x2 LB: > { %s26_s18 = sadd.s32 1, %s1467_s16  ;;  %p1089_p0 = scmp.ge.s32.totalorder %s1471_s17, 1  ;;  %s1471_s17 = sphi %s1502_s17, %s14_s17   ;;  %s1467_s16 = sphi %s1500_s16, %s1721_s16   ;;  %s1463_s15 = sphi %s1498_s15, %s1720_s15  }
   0x3   : > { %p28_p1 = scmp.ge.s32.totalorder %s26_s18, 3  ;;  %p183_p2 = scmp.lt.s32.totalorder %s1471_s17, 4 }
   0x5   : > { %s1723_s18 = smov (%p28_p1, %s26_s18), 0  ;;  %p184_p3 = pnand %p1089_p0, %p183_p2 }
   0x6   : > { %s1090_s11 = sshll.u32 (!%p184_p3), %s1463_s15, 4 }
   0x7   : > { %187 = sbr.rel (%p184_p3) target bundleno = 449 (0x1c1), region = 36  ;;  %p216_p4 = scmp.lt.s32.totalorder (!%p184_p3), %s1090_s11, 47 }
   0xc   : > { %v1327_v0 = vld [vmem:[%s1716_s1 + $0x38] sm:$0xff]  ;;  %v1326_v3 = vld [vmem:[%s1716_s1 + $0x30] sm:$0xff]  ;;  %v1325_v6 = vld [vmem:[%s1716_s1 + $0x28] sm:$0xff]  ;;  %s1725_s11 = smov (!%p216_p4, %s1090_s11), 47 }
   0xd   : > { %v1335_v1 = vld [vmem:[%s1716_s1 + $0x78] sm:$0xff]  ;;  %625 = vmatpush.bf16.msra.mxu0 %v1327_v0  ;;  %v1334_v4 = vld [vmem:[%s1716_s1 + $0x70] sm:$0xff]  ;;  %v1333_v7 = vld [vmem:[%s1716_s1 + $0x68] sm:$0xff]  ;;  %s1423_s5 = smul.u32 12, %s1725_s11  ;;  %s1093_s23 = sshll.u32 %s1725_s11, 2 }
   0xe   : > { %v1343_v2 = vld [vmem:[%s1716_s1 + $0xb8] sm:$0xff]  ;;  %674 = vmatpush.bf16.msra.mxu1 %v1335_v1  ;;  %v1342_v5 = vld [vmem:[%s1716_s1 + $0xb0] sm:$0xff]  ;;  %v1341_v8 = vld [vmem:[%s1716_s1 + $0xa8] sm:$0xff]  ;;  %s1696_s26 = scalar_lea.vmem %s1719_s4, %s1093_s23 }
   0xf   : > { %723 = vmatpush.bf16.msra.mxu2 %v1343_v2  ;;  %v1324_v9 = vld [vmem:[%s1716_s1 + $0x20] sm:$0xff]  ;;  %v1323_v12 = vld [vmem:[%s1716_s1 + $0x18] sm:$0xff]  ;;  %v1322_v15 = vld [vmem:[%s1716_s1 + $0x10] sm:$0xff]  ;;  %s1585_s19 = scalar_lea.vmem %s1715_s0, %s1423_s5 }
  0x10   : > { %v1332_v10 = vld [vmem:[%s1716_s1 + $0x60] sm:$0xff]  ;;  %v1331_v13 = vld [vmem:[%s1716_s1 + $0x58] sm:$0xff]  ;;  %v1330_v16 = vld [vmem:[%s1716_s1 + $0x50] sm:$0xff] }
  0x11   : > { %626 = vmatpush.bf16.msra.mxu0 %v1326_v3  ;;  %v1340_v11 = vld [vmem:[%s1716_s1 + $0xa0] sm:$0xff]  ;;  %v1339_v14 = vld [vmem:[%s1716_s1 + $0x98] sm:$0xff]  ;;  %v1338_v17 = vld [vmem:[%s1716_s1 + $0x90] sm:$0xff] }
  0x12   : > { %675 = vmatpush.bf16.msra.mxu1 %v1334_v4  ;;  %v1321_v18 = vld [vmem:[%s1716_s1 + $0x8] sm:$0xff]  ;;  %v1320_v21 = vld [vmem:[%s1716_s1] sm:$0xff]  ;;  %v1098_v26 = vld [vmem:[%s1585_s19 + $0xc] sm:$0xf0] }
  0x13   : > { %724 = vmatpush.bf16.msra.mxu2 %v1342_v5  ;;  %v1329_v19 = vld [vmem:[%s1716_s1 + $0x48] sm:$0xff]  ;;  %v1328_v22 = vld [vmem:[%s1716_s1 + $0x40] sm:$0xff]  ;;  %v1346_v29 = vld [vmem:[%s1585_s19 + $0x10] sm:$0xf0] }
  0x14   : > { %v1337_v20 = vld [vmem:[%s1716_s1 + $0x88] sm:$0xff]  ;;  %v1096_v23 = vld [vmem:[%s1585_s19] sm:$0xf]  ;;  %v1344_v25 = vld [vmem:[%s1585_s19 + $0x4] sm:$0xf] }
  0x15   : > { %627 = vmatpush.bf16.msra.mxu0 %v1325_v6  ;;  %v1345_v24 = vld [vmem:[%s1585_s19 + $0x8] sm:$0xf0]  ;;  %v1336_v27 = vld [vmem:[%s1716_s1 + $0x80] sm:$0xff]  ;;  %v1104_v28 = vld [vmem:[%s1585_s19 + $0x8] sm:$0xf]  ;;  %v1101_v31 = vor.u32 %v1344_v25, %v1098_v26 }
  0x16   : > { %676 = vmatpush.bf16.msra.mxu1 %v1333_v7  ;;  %v1097_v30 = vor.u32 %v1345_v24, %v1096_v23  ;;  %v1105_v32 = vor.u32 %v1346_v29, %v1104_v28  ;;  %v1108_v33 = vld [vmem:[%s1585_s19 + $0x18] sm:$0xf]  ;;  %v1348_v34 = vld [vmem:[%s1585_s19 + $0x20] sm:$0xf0]  ;;  %v1347_v35 = vld [vmem:[%s1585_s19 + $0x1c] sm:$0xf] }
  0x17   : > { %725 = vmatpush.bf16.msra.mxu2 %v1341_v8  ;;  %v1110_v36 = vld [vmem:[%s1585_s19 + $0x24] sm:$0xf0]  ;;  %v1116_v37 = vld [vmem:[%s1585_s19 + $0x20] sm:$0xf]  ;;  %v1349_v38 = vld [vmem:[%s1585_s19 + $0x28] sm:$0xf0]  ;;  %v1109_v39 = vor.u32 %v1348_v34, %v1108_v33 }
  0x18   : > { %v1113_v40 = vor.u32 %v1347_v35, %v1110_v36  ;;  %v1117_v41 = vor.u32 %v1349_v38, %v1116_v37  ;;  %v1120_v42 = vld [vmem:[%s1585_s19 + $0x30] sm:$0xf]  ;;  %v1351_v43 = vld [vmem:[%s1585_s19 + $0x38] sm:$0xf0]  ;;  %v1350_v44 = vld [vmem:[%s1585_s19 + $0x34] sm:$0xf] }
  0x19   : > { %628 = vmatpush.bf16.msra.mxu0 %v1324_v9  ;;  %v1122_v45 = vld [vmem:[%s1585_s19 + $0x3c] sm:$0xf0]  ;;  %v1128_v46 = vld [vmem:[%s1585_s19 + $0x38] sm:$0xf]  ;;  %v1352_v47 = vld [vmem:[%s1585_s19 + $0x40] sm:$0xf0]  ;;  %v1121_v48 = vor.u32 %v1351_v43, %v1120_v42 }
  0x1a   : > { %677 = vmatpush.bf16.msra.mxu1 %v1332_v10  ;;  %v1125_v49 = vor.u32 %v1350_v44, %v1122_v45  ;;  %v1129_v50 = vor.u32 %v1352_v47, %v1128_v46  ;;  %v1132_v51 = vld [vmem:[%s1585_s19 + $0x48] sm:$0xf]  ;;  %v1354_v52 = vld [vmem:[%s1585_s19 + $0x50] sm:$0xf0]  ;;  %v1353_v53 = vld [vmem:[%s1585_s19 + $0x4c] sm:$0xf] }
  0x1b   : > { %726 = vmatpush.bf16.msra.mxu2 %v1340_v11  ;;  %v1134_v54 = vld [vmem:[%s1585_s19 + $0x54] sm:$0xf0]  ;;  %v1140_v55 = vld [vmem:[%s1585_s19 + $0x50] sm:$0xf]  ;;  %v1355_v56 = vld [vmem:[%s1585_s19 + $0x58] sm:$0xf0]  ;;  %v1133_v57 = vor.u32 %v1354_v52, %v1132_v51 }
  0x1c   : > { %v1137_v58 = vor.u32 %v1353_v53, %v1134_v54  ;;  %v1141_v59 = vor.u32 %v1355_v56, %v1140_v55  ;;  %v1144_v60 = vld [vmem:[%s1585_s19 + $0x60] sm:$0xf]  ;;  %v1357_v61 = vld [vmem:[%s1585_s19 + $0x68] sm:$0xf0]  ;;  %v1356_v62 = vld [vmem:[%s1585_s19 + $0x64] sm:$0xf] }
  0x1d   : > { %629 = vmatpush.bf16.msra.mxu0 %v1323_v12  ;;  %v1146_v63 = vld [vmem:[%s1585_s19 + $0x6c] sm:$0xf0]  ;;  %v1152_v0 = vld [vmem:[%s1585_s19 + $0x68] sm:$0xf]  ;;  %v1358_v1 = vld [vmem:[%s1585_s19 + $0x70] sm:$0xf0]  ;;  %v1145_v2 = vor.u32 %v1357_v61, %v1144_v60 }
  0x1e   : > { %678 = vmatpush.bf16.msra.mxu1 %v1331_v13  ;;  %v1149_v3 = vor.u32 %v1356_v62, %v1146_v63  ;;  %v1153_v4 = vor.u32 %v1358_v1, %v1152_v0  ;;  %v1156_v5 = vld [vmem:[%s1585_s19 + $0x78] sm:$0xf]  ;;  %v1360_v6 = vld [vmem:[%s1585_s19 + $0x80] sm:$0xf0]  ;;  %v1359_v7 = vld [vmem:[%s1585_s19 + $0x7c] sm:$0xf] }
  0x1f   : > { %727 = vmatpush.bf16.msra.mxu2 %v1339_v14  ;;  %v1158_v8 = vld [vmem:[%s1585_s19 + $0x84] sm:$0xf0]  ;;  %v1164_v9 = vld [vmem:[%s1585_s19 + $0x80] sm:$0xf]  ;;  %v1361_v10 = vld [vmem:[%s1585_s19 + $0x88] sm:$0xf0]  ;;  %v1157_v11 = vor.u32 %v1360_v6, %v1156_v5 }
  0x20   : > { %v1161_v12 = vor.u32 %v1359_v7, %v1158_v8  ;;  %v1165_v13 = vor.u32 %v1361_v10, %v1164_v9  ;;  %v1375_v14 = vld [vmem:[%s1718_s3 + $0x38] sm:$0xff]  ;;  %v1373_v24 = vld [vmem:[%s1718_s3 + $0x28] sm:$0xff]  ;;  %v1372_v26 = vld [vmem:[%s1718_s3 + $0x20] sm:$0xff] }
  0x21   : > { %630 = vmatpush.bf16.msra.mxu0 %v1322_v15  ;;  %931 = vmatpush.bf16.msra.mxu3 %v1375_v14  ;;  %v1374_v15 = vld [vmem:[%s1718_s3 + $0x30] sm:$0xff]  ;;  %v1180_v28 = vld [vmem:[%s1585_s19 + $0xa8] sm:$0xf]  ;;  %v1367_v34 = vld [vmem:[%s1585_s19 + $0xb8] sm:$0xf0] }
  0x22   : > { %679 = vmatpush.bf16.msra.mxu1 %v1330_v16  ;;  %v1168_v16 = vld [vmem:[%s1585_s19 + $0x90] sm:$0xf]  ;;  %v1369_v37 = vld [vmem:[%s1718_s3 + $0x8] sm:$0xff]  ;;  %v1674_v47 = vld [vmem:[%s1717_s2] ss:$0 sm:$0xff] }
  0x23   : > { %728 = vmatpush.bf16.msra.mxu2 %v1338_v17  ;;  %v1363_v17 = vld [vmem:[%s1585_s19 + $0x98] sm:$0xf0]  ;;  %v1370_v29 = vld [vmem:[%s1718_s3 + $0x10] sm:$0xff] }
  0x24   : > { %v1188_v33 = vld [vmem:[%s1585_s19 + $0xb0] sm:$0xf] }
  0x25   : > { %631 = vmatpush.bf16.msra.mxu0 %v1321_v18  ;;  %932 = vmatpush.bf16.msra.mxu3 %v1374_v15  ;;  %v1362_v18 = vld [vmem:[%s1585_s19 + $0x94] sm:$0xf]  ;;  %v1189_v38 = vor.u32 %v1367_v34, %v1188_v33 }
  0x26   : > { %680 = vmatpush.bf16.msra.mxu1 %v1329_v19  ;;  %v1170_v19 = vld [vmem:[%s1585_s19 + $0x9c] sm:$0xf0] }
  0x27   : > { %729 = vmatpush.bf16.msra.mxu2 %v1337_v20  ;;  %v1176_v20 = vld [vmem:[%s1585_s19 + $0x98] sm:$0xf]  ;;  %v1173_v23 = vor.u32 %v1362_v18, %v1170_v19 }
  0x29   : > { %632 = vmatpush.bf16.msra.mxu0 %v1320_v21  ;;  %v1364_v21 = vld [vmem:[%s1585_s19 + $0xa0] sm:$0xf0]  ;;  %933 = vmatpush.bf16.msra.mxu3 %v1373_v24 }
  0x2a   : > { %681 = vmatpush.bf16.msra.mxu1 %v1328_v22  ;;  %v1169_v22 = vor.u32 %v1363_v17, %v1168_v16  ;;  %v1177_v25 = vor.u32 %v1364_v21, %v1176_v20 }
  0x2b   : > { %730 = vmatpush.bf16.msra.mxu2 %v1336_v27  ;;  %v1371_v27 = vld [vmem:[%s1718_s3 + $0x18] sm:$0xff] }
  0x2c   : > { %633 = vmatmul.bf16.vlgmr.msra.gmra.mxu0 %v1097_v30  ;;  %v1366_v30 = vld [vmem:[%s1585_s19 + $0xb0] sm:$0xf0] }
  0x2d   : > { %682 = vmatmul.bf16.vlgmr.msra.gmra.mxu1 %v1101_v31  ;;  %934 = vmatpush.bf16.msra.mxu3 %v1372_v26  ;;  %v1365_v31 = vld [vmem:[%s1585_s19 + $0xac] sm:$0xf]  ;;  %v1181_v35 = vor.u32 %v1366_v30, %v1180_v28 }
  0x2e   : > { %731 = vmatmul.bf16.vlgmr.msra.gmra.mxu2 %v1105_v32  ;;  %v1182_v32 = vld [vmem:[%s1585_s19 + $0xb4] sm:$0xf0] }
  0x2f   : > { %v1185_v36 = vor.u32 %v1365_v31, %v1182_v32 }
  0x31   : > { %935 = vmatpush.bf16.msra.mxu3 %v1371_v27 }
  0x35   : > { %936 = vmatpush.bf16.msra.mxu3 %v1370_v29 }
  0x39   : > { %937 = vmatpush.bf16.msra.mxu3 %v1369_v37 }
  0x3c   : > { %638 = vmatmul.bf16.gmra.mxu0 %v1109_v39  ;;  %v1368_v39 = vld [vmem:[%s1718_s3] sm:$0xff] }
  0x3d   : > { %687 = vmatmul.bf16.gmra.mxu1 %v1113_v40  ;;  %938 = vmatpush.bf16.msra.mxu3 %v1368_v39 }
  0x3e   : > { %736 = vmatmul.bf16.gmra.mxu2 %v1117_v41 }
  0x4c   : > { %643 = vmatmul.bf16.gmra.mxu0 %v1121_v48 }
  0x4d   : > { %692 = vmatmul.bf16.gmra.mxu1 %v1125_v49 }
  0x4e   : > { %741 = vmatmul.bf16.gmra.mxu2 %v1129_v50 }
  0x5c   : > { %648 = vmatmul.bf16.gmra.mxu0 %v1133_v57 }
  0x5d   : > { %697 = vmatmul.bf16.gmra.mxu1 %v1137_v58 }
  0x5e   : > { %746 = vmatmul.bf16.gmra.mxu2 %v1141_v59 }
  0x6c   : > { %653 = vmatmul.bf16.gmra.mxu0 %v1145_v2 }
  0x6d   : > { %702 = vmatmul.bf16.gmra.mxu1 %v1149_v3 }
  0x6e   : > { %751 = vmatmul.bf16.gmra.mxu2 %v1153_v4 }
  0x7c   : > { %658 = vmatmul.bf16.gmra.mxu0 %v1157_v11 }
  0x7d   : > { %707 = vmatmul.bf16.gmra.mxu1 %v1161_v12 }
  0x7e   : > { %756 = vmatmul.bf16.gmra.mxu2 %v1165_v13 }
  0x8c   : > { %663 = vmatmul.bf16.gmra.mxu0 %v1169_v22 }
  0x8d   : > { %712 = vmatmul.bf16.gmra.mxu1 %v1173_v23 }
  0x8e   : > { %761 = vmatmul.bf16.gmra.mxu2 %v1177_v25 }
  0x9c   : > { %668 = vmatmul.bf16.gmra.mxu0 %v1181_v35 }
  0x9d   : > { %717 = vmatmul.bf16.gmra.mxu1 %v1185_v36 }
  0x9e   : > { %766 = vmatmul.bf16.gmra.mxu2 %v1189_v38 }
  0xa9   : > { %v634_v40 = vpop.f32.mrf.mxu0 }
  0xaa   : > { %v683_v41 = vpop.f32.mrf.mxu1 }
  0xab   : > { %v684_v43 = vadd.f32 %v683_v41, %v634_v40 }
  0xb1   : > { %v732_v42 = vpop.f32.mrf.mxu2  ;;  %v636_v44 = vpop.f32.mrf.mxu0 }
  0xb2   : > { %v685_v45 = vpop.f32.mrf.mxu1  ;;  %v733_v46 = vadd.f32 %v732_v42, %v684_v43 }
  0xb3   : > { %v686_v48 = vadd.f32 %v685_v45, %v636_v44 }
  0xb4   : > { %v827_v50 = vadd.f32 %v1674_v47, %v733_v46 }
  0xb6   : > { %v843_v55 = vmax.f32 %v827_v50, 0.0 }
  0xb9   : > { %v734_v49 = vpop.f32.mrf.mxu2  ;;  %v639_v52 = vpop.f32.mrf.mxu0 }
  0xba   : > { %v735_v51 = vadd.f32 %v734_v49, %v686_v48  ;;  %v688_v53 = vpop.f32.mrf.mxu1 }
  0xbb   : > { %v689_v59 = vadd.f32 %v688_v53, %v639_v52 }
  0xbc   : > { %v828_v54 = vadd.f32 %v1674_v47, %v735_v51 }
  0xbe   : > { %v844_v56 = vmax.f32 %v828_v54, 0.0 }
  0xc0   : > { %v859_v57 = vpack.c.bf16 %v844_v56, %v843_v55 }
  0xc1   : > { %v737_v58 = vpop.f32.mrf.mxu2  ;;  %v641_v60 = vpop.f32.mrf.mxu0 }
  0xc2   : > { %939 = vmatmul.bf16.vlgmr.msra.gmra.mxu3 %v859_v57  ;;  %v690_v61 = vpop.f32.mrf.mxu1  ;;  %v738_v62 = vadd.f32 %v737_v58, %v689_v59 }
  0xc3   : > { %v691_v63 = vadd.f32 %v690_v61, %v641_v60 }
  0xc4   : > { %v829_v1 = vadd.f32 %v1674_v47, %v738_v62 }
  0xc6   : > { %v845_v6 = vmax.f32 %v829_v1, 0.0 }
  0xc9   : > { %v739_v0 = vpop.f32.mrf.mxu2  ;;  %v644_v3 = vpop.f32.mrf.mxu0 }
  0xca   : > { %v740_v2 = vadd.f32 %v739_v0, %v691_v63  ;;  %v693_v4 = vpop.f32.mrf.mxu1 }
  0xcb   : > { %v694_v10 = vadd.f32 %v693_v4, %v644_v3 }
  0xcc   : > { %v830_v5 = vadd.f32 %v1674_v47, %v740_v2 }
  0xce   : > { %v846_v7 = vmax.f32 %v830_v5, 0.0 }
  0xd0   : > { %v860_v8 = vpack.c.bf16 %v846_v7, %v845_v6 }
  0xd1   : > { %v742_v9 = vpop.f32.mrf.mxu2  ;;  %v646_v11 = vpop.f32.mrf.mxu0 }
  0xd2   : > { %944 = vmatmul.bf16.gmra.mxu3 %v860_v8  ;;  %v695_v12 = vpop.f32.mrf.mxu1  ;;  %v743_v13 = vadd.f32 %v742_v9, %v694_v10 }
  0xd3   : > { %v696_v14 = vadd.f32 %v695_v12, %v646_v11 }
  0xd4   : > { %v831_v16 = vadd.f32 %v1674_v47, %v743_v13 }
  0xd6   : > { %v847_v21 = vmax.f32 %v831_v16, 0.0 }
  0xd9   : > { %v744_v15 = vpop.f32.mrf.mxu2  ;;  %v649_v18 = vpop.f32.mrf.mxu0 }
  0xda   : > { %v745_v17 = vadd.f32 %v744_v15, %v696_v14  ;;  %v698_v19 = vpop.f32.mrf.mxu1 }
  0xdb   : > { %v699_v25 = vadd.f32 %v698_v19, %v649_v18 }
  0xdc   : > { %v832_v20 = vadd.f32 %v1674_v47, %v745_v17 }
  0xde   : > { %v848_v22 = vmax.f32 %v832_v20, 0.0 }
  0xe0   : > { %v861_v23 = vpack.c.bf16 %v848_v22, %v847_v21 }
  0xe1   : > { %v747_v24 = vpop.f32.mrf.mxu2  ;;  %v651_v26 = vpop.f32.mrf.mxu0 }
  0xe2   : > { %949 = vmatmul.bf16.gmra.mxu3 %v861_v23  ;;  %v700_v27 = vpop.f32.mrf.mxu1  ;;  %v748_v28 = vadd.f32 %v747_v24, %v699_v25 }
  0xe3   : > { %v701_v29 = vadd.f32 %v700_v27, %v651_v26 }
  0xe4   : > { %v833_v31 = vadd.f32 %v1674_v47, %v748_v28 }
  0xe6   : > { %v849_v36 = vmax.f32 %v833_v31, 0.0 }
  0xe9   : > { %v749_v30 = vpop.f32.mrf.mxu2  ;;  %v654_v33 = vpop.f32.mrf.mxu0 }
  0xea   : > { %v750_v32 = vadd.f32 %v749_v30, %v701_v29  ;;  %v703_v34 = vpop.f32.mrf.mxu1 }
  0xeb   : > { %v704_v40 = vadd.f32 %v703_v34, %v654_v33 }
  0xec   : > { %v834_v35 = vadd.f32 %v1674_v47, %v750_v32 }
  0xee   : > { %v850_v37 = vmax.f32 %v834_v35, 0.0 }
  0xf0   : > { %v862_v38 = vpack.c.bf16 %v850_v37, %v849_v36 }
  0xf1   : > { %v752_v39 = vpop.f32.mrf.mxu2  ;;  %v656_v41 = vpop.f32.mrf.mxu0 }
  0xf2   : > { %954 = vmatmul.bf16.gmra.mxu3 %v862_v38  ;;  %v705_v42 = vpop.f32.mrf.mxu1  ;;  %v753_v43 = vadd.f32 %v752_v39, %v704_v40 }
  0xf3   : > { %v706_v44 = vadd.f32 %v705_v42, %v656_v41 }
  0xf4   : > { %v835_v46 = vadd.f32 %v1674_v47, %v753_v43 }
  0xf6   : > { %v851_v52 = vmax.f32 %v835_v46, 0.0 }
  0xf9   : > { %v754_v45 = vpop.f32.mrf.mxu2  ;;  %v659_v49 = vpop.f32.mrf.mxu0 }
  0xfa   : > { %v755_v48 = vadd.f32 %v754_v45, %v706_v44  ;;  %v708_v50 = vpop.f32.mrf.mxu1 }
  0xfb   : > { %v709_v56 = vadd.f32 %v708_v50, %v659_v49 }
  0xfc   : > { %v836_v51 = vadd.f32 %v1674_v47, %v755_v48 }
  0xfe   : > { %v852_v53 = vmax.f32 %v836_v51, 0.0 }
 0x100   : > { %v863_v54 = vpack.c.bf16 %v852_v53, %v851_v52 }
 0x101   : > { %v757_v55 = vpop.f32.mrf.mxu2  ;;  %v661_v57 = vpop.f32.mrf.mxu0 }
 0x102   : > { %959 = vmatmul.bf16.gmra.mxu3 %v863_v54  ;;  %v710_v58 = vpop.f32.mrf.mxu1  ;;  %v758_v59 = vadd.f32 %v757_v55, %v709_v56 }
 0x103   : > { %v711_v60 = vadd.f32 %v710_v58, %v661_v57 }
 0x104   : > { %v837_v62 = vadd.f32 %v1674_v47, %v758_v59 }
 0x106   : > { %v853_v3 = vmax.f32 %v837_v62, 0.0 }
 0x109   : > { %v759_v61 = vpop.f32.mrf.mxu2  ;;  %v664_v0 = vpop.f32.mrf.mxu0 }
 0x10a   : > { %v760_v63 = vadd.f32 %v759_v61, %v711_v60  ;;  %v713_v1 = vpop.f32.mrf.mxu1 }
 0x10b   : > { %v714_v7 = vadd.f32 %v713_v1, %v664_v0 }
 0x10c   : > { %v838_v2 = vadd.f32 %v1674_v47, %v760_v63 }
 0x10e   : > { %v854_v4 = vmax.f32 %v838_v2, 0.0 }
 0x110   : > { %v864_v5 = vpack.c.bf16 %v854_v4, %v853_v3 }
 0x111   : > { %v762_v6 = vpop.f32.mrf.mxu2  ;;  %v666_v8 = vpop.f32.mrf.mxu0 }
 0x112   : > { %964 = vmatmul.bf16.gmra.mxu3 %v864_v5  ;;  %v715_v9 = vpop.f32.mrf.mxu1  ;;  %v763_v10 = vadd.f32 %v762_v6, %v714_v7 }
 0x113   : > { %v716_v11 = vadd.f32 %v715_v9, %v666_v8 }
 0x114   : > { %v839_v13 = vadd.f32 %v1674_v47, %v763_v10 }
 0x116   : > { %v855_v18 = vmax.f32 %v839_v13, 0.0 }
 0x119   : > { %v764_v12 = vpop.f32.mrf.mxu2  ;;  %v669_v15 = vpop.f32.mrf.mxu0 }
 0x11a   : > { %v765_v14 = vadd.f32 %v764_v12, %v716_v11  ;;  %v718_v16 = vpop.f32.mrf.mxu1 }
 0x11b   : > { %v719_v22 = vadd.f32 %v718_v16, %v669_v15 }
 0x11c   : > { %v840_v17 = vadd.f32 %v1674_v47, %v765_v14 }
 0x11e   : > { %v856_v19 = vmax.f32 %v840_v17, 0.0 }
 0x120   : > { %v865_v20 = vpack.c.bf16 %v856_v19, %v855_v18 }
 0x121   : > { %v767_v21 = vpop.f32.mrf.mxu2  ;;  %v671_v23 = vpop.f32.mrf.mxu0 }
 0x122   : > { %969 = vmatmul.bf16.gmra.mxu3 %v865_v20  ;;  %v720_v24 = vpop.f32.mrf.mxu1  ;;  %v768_v25 = vadd.f32 %v767_v21, %v719_v22 }
 0x123   : > { %v721_v26 = vadd.f32 %v720_v24, %v671_v23 }
 0x124   : > { %v841_v28 = vadd.f32 %v1674_v47, %v768_v25 }
 0x126   : > { %v857_v31 = vmax.f32 %v841_v28, 0.0 }
 0x129   : > { %v769_v27 = vpop.f32.mrf.mxu2 }
 0x12a   : > { %v770_v29 = vadd.f32 %v769_v27, %v721_v26 }
 0x12c   : > { %v842_v30 = vadd.f32 %v1674_v47, %v770_v29 }
 0x12e   : > { %v858_v32 = vmax.f32 %v842_v30, 0.0 }
 0x130   : > { %v866_v33 = vpack.c.bf16 %v858_v32, %v857_v31 }
 0x132   : > { %974 = vmatmul.bf16.gmra.mxu3 %v866_v33 }
 0x145   : > { %v940_v34 = vpop.f32.mrf.mxu3 }
 0x14d   : > { %v942_v35 = vpop.f32.mrf.mxu3 }
 0x14e   : > { %v1379_v36 = vpack.c.bf16 %v942_v35, %v940_v34 }
 0x150   : > { %1380 = vst [vmem:[%s1696_s26] sm:$0xff] %v1379_v36  }
 0x155   : > { %v945_v47 = vpop.f32.mrf.mxu3 }
 0x15d   : > { %v947_v37 = vpop.f32.mrf.mxu3 }
 0x15e   : > { %v1384_v38 = vpack.c.bf16 %v947_v37, %v945_v47 }
 0x160   : > { %1416 = vst [vmem:[%s1696_s26 + $0x8] sm:$0xff] %v1384_v38  }
 0x165   : > { %v950_v39 = vpop.f32.mrf.mxu3 }
 0x16d   : > { %v952_v40 = vpop.f32.mrf.mxu3 }
 0x16e   : > { %v1389_v41 = vpack.c.bf16 %v952_v40, %v950_v39 }
 0x170   : > { %1417 = vst [vmem:[%s1696_s26 + $0x10] sm:$0xff] %v1389_v41  }
 0x175   : > { %v955_v42 = vpop.f32.mrf.mxu3 }
 0x17d   : > { %v957_v43 = vpop.f32.mrf.mxu3 }
 0x17e   : > { %v1394_v44 = vpack.c.bf16 %v957_v43, %v955_v42 }
 0x180   : > { %1418 = vst [vmem:[%s1696_s26 + $0x18] sm:$0xff] %v1394_v44  }
 0x185   : > { %v960_v45 = vpop.f32.mrf.mxu3 }
 0x18d   : > { %v962_v46 = vpop.f32.mrf.mxu3 }
 0x18e   : > { %v1399_v48 = vpack.c.bf16 %v962_v46, %v960_v45 }
 0x190   : > { %1419 = vst [vmem:[%s1696_s26 + $0x20] sm:$0xff] %v1399_v48  }
 0x195   : > { %v965_v49 = vpop.f32.mrf.mxu3 }
 0x19d   : > { %v967_v50 = vpop.f32.mrf.mxu3 }
 0x19e   : > { %v1404_v51 = vpack.c.bf16 %v967_v50, %v965_v49 }
 0x1a0   : > { %1420 = vst [vmem:[%s1696_s26 + $0x28] sm:$0xff] %v1404_v51  }
 0x1a5   : > { %v970_v52 = vpop.f32.mrf.mxu3 }
 0x1ad   : > { %v972_v53 = vpop.f32.mrf.mxu3 }
 0x1ae   : > { %v1409_v54 = vpack.c.bf16 %v972_v53, %v970_v52 }
 0x1b0   : > { %1421 = vst [vmem:[%s1696_s26 + $0x30] sm:$0xff] %v1409_v54  }
 0x1b5   : > { %v975_v55 = vpop.f32.mrf.mxu3 }
 0x1bd   : > { %v977_v56 = vpop.f32.mrf.mxu3 }
 0x1be   : > { %v1414_v57 = vpack.c.bf16 %v977_v56, %v975_v55 }
 0x1c0   : > { %1422 = vst [vmem:[%s1696_s26 + $0x38] sm:$0xff] %v1414_v57  }
 0x1c1 PF: > { %s14_s17 = sadd.s32 1, %s1471_s17   ;;  %s1720_s15 = smov %s1467_s16 }
 0x1c2   : > { %p11_p5 = scmp.ge.s32.totalorder %s14_s17, 5   ;;  %s1721_s16 = smov %s1723_s18 }
 0x1c4   :  { %13 = sbr.rel (!%p11_p5) target bundleno = 2 (0x2), region = 75 }

// kernel: malware_gnn_forward.7
= control target key start
LH: loop header
LB: loop body
LE: loop exit
PB: predicated region body
PF: predicated region fallthrough
CT: control target
= control target key end

     0   :  { %s1410_s21 = smov 0   ;;  %s1412_s22 = smov 0   ;;  %s1689_s0 = inlined_call_operand.vmem [shape: bf16[384,384], index: 0, kind: input, shape index: {}]   ;;  %s1690_s1 = inlined_call_operand.vmem [shape: bf16[384,128], index: 1, kind: input, shape index: {}]   ;;  %s1691_s2 = inlined_call_operand.vmem [shape: f32[1,128], index: 2, kind: input, shape index: {}]   ;;  %s1692_s3 = inlined_call_operand.vmem [shape: f32[8,384], index: 3, kind: input, shape index: {}]   ;;  %s1693_s4 = inlined_call_operand.vmem [shape: f32[128,128], index: 4, kind: input, shape index: {}]   ;;  %s1694_s5 = inlined_call_operand.vmem [shape: f32[1,128], index: 5, kind: input, shape index: {}]   ;;  %s1695_s6 = inlined_call_operand.vmem [shape: f32[8,128], index: 6, kind: output, shape index: {}]  }
   0x1   :  { %s1414_s23 = smov 0  }
   0x2 LB: > { %s28_s24 = sadd.s32 1, %s1368_s22  ;;  %p1049_p0 = scmp.ge.s32.totalorder %s1372_s23, 1  ;;  %s1372_s23 = sphi %s1414_s23, %s16_s23   ;;  %s1368_s22 = sphi %s1412_s22, %s1697_s22   ;;  %s1364_s21 = sphi %s1410_s21, %s1696_s21  }
   0x3   : > { %p30_p1 = scmp.ge.s32.totalorder %s28_s24, 3  ;;  %p237_p2 = scmp.lt.s32.totalorder %s1372_s23, 4 }
   0x5   : > { %s1699_s24 = smov (%p30_p1, %s28_s24), 0  ;;  %p238_p3 = pnand %p1049_p0, %p237_p2 }
   0x6   : > { %s1050_s25 = sshll.u32 (!%p238_p3), %s1364_s21, 4  ;;  %p283_p4 = scmp.lt.s32.totalorder (!%p238_p3), %s1364_s21, 2 }
   0x7   : > { %241 = sbr.rel (%p238_p3) target bundleno = 615 (0x267), region = 44  ;;  %p273_p5 = scmp.lt.s32.totalorder (!%p238_p3), %s1050_s25, 47 }
   0x8   : > { %p287_p6 = scmp.eq.s32.totalorder (!%p238_p3), %s1364_s21, 0 }
   0xc   : > { %s284_s26 = scalar_select %p283_p4, %s1364_s21, 2  ;;  %v1374_v0 = vmov (%p287_p6), 0.0  }
   0xd   : > { %s1701_s25 = smov (!%p273_p5, %s1050_s25), 47  ;;  %292 = sbr.rel (!%p287_p6) target bundleno = 18 (0x12), region = 48  ;;  %293 = vst [vmem:[#allocation3] sm:$0xff] (%p287_p6), %v1374_v0 }
   0xe   : > { %s1052_s27 = sshll.u32 %s284_s26, 3  ;;  %s1322_s28 = smul.u32 12, %s1701_s25 }
   0xf   : > { %s1437_s7 = scalar_lea.vmem %s1692_s3, %s1052_s27 }
  0x10   : > { %s1442_s10 = scalar_lea.vmem %s1689_s0, %s1322_s28 }
  0x12 PF: > { %v1257_v1 = vld [vmem:[%s1690_s1 + $0x38] sm:$0xff]  ;;  %v1256_v4 = vld [vmem:[%s1690_s1 + $0x30] sm:$0xff]  ;;  %v1255_v7 = vld [vmem:[%s1690_s1 + $0x28] sm:$0xff]  ;;  %p1246_p7 = scmp.ne.s32.totalorder %s1364_s21, 2 }
  0x13   : > { %v1450_v2 = vld [vmem:[%s1690_s1 + $0x78] sm:$0xff]  ;;  %1298 = vmatpush.bf16.msra.mxu3 %v1257_v1  ;;  %v1264_v5 = vld [vmem:[%s1690_s1 + $0x70] sm:$0xff]  ;;  %686 = vmatpush.bf16.msra.mxu0 %v1257_v1  ;;  %v1263_v8 = vld [vmem:[%s1690_s1 + $0x68] sm:$0xff] }
  0x14   : > { %v1455_v3 = vld [vmem:[%s1690_s1 + $0xb8] sm:$0xff]  ;;  %1306 = vmatpush.bf16.msra.mxu1 %v1450_v2  ;;  %v1468_v6 = vld [vmem:[%s1690_s1 + $0xb0] sm:$0xff]  ;;  %v1480_v9 = vld [vmem:[%s1690_s1 + $0xa8] sm:$0xff] }
  0x15   : > { %1314 = vmatpush.bf16.msra.mxu2 %v1455_v3  ;;  %v1254_v10 = vld [vmem:[%s1690_s1 + $0x20] sm:$0xff]  ;;  %v1253_v13 = vld [vmem:[%s1690_s1 + $0x18] sm:$0xff]  ;;  %v1252_v16 = vld [vmem:[%s1690_s1 + $0x10] sm:$0xff] }
  0x16   : > { %v1262_v11 = vld [vmem:[%s1690_s1 + $0x60] sm:$0xff]  ;;  %v1261_v14 = vld [vmem:[%s1690_s1 + $0x58] sm:$0xff]  ;;  %v1260_v17 = vld [vmem:[%s1690_s1 + $0x50] sm:$0xff] }
  0x17   : > { %1299 = vmatpush.bf16.msra.mxu3 %v1256_v4  ;;  %687 = vmatpush.bf16.msra.mxu0 %v1256_v4  ;;  %v1492_v12 = vld [vmem:[%s1690_s1 + $0xa0] sm:$0xff]  ;;  %v1504_v15 = vld [vmem:[%s1690_s1 + $0x98] sm:$0xff]  ;;  %v1516_v18 = vld [vmem:[%s1690_s1 + $0x90] sm:$0xff] }
  0x18   : > { %1307 = vmatpush.bf16.msra.mxu1 %v1264_v5  ;;  %v1251_v19 = vld [vmem:[%s1690_s1 + $0x8] sm:$0xff]  ;;  %v1250_v22 = vld [vmem:[%s1690_s1] sm:$0xff]  ;;  %v1068_v24 = vld [vmem:[%s1442_s10 + $0x18] sm:$0xf] }
  0x19   : > { %1315 = vmatpush.bf16.msra.mxu2 %v1468_v6  ;;  %v1259_v20 = vld [vmem:[%s1690_s1 + $0x48] sm:$0xff]  ;;  %v1258_v23 = vld [vmem:[%s1690_s1 + $0x40] sm:$0xff]  ;;  %v1277_v26 = vld [vmem:[%s1442_s10 + $0x1c] sm:$0xf] }
  0x1a   : > { %v1528_v21 = vld [vmem:[%s1690_s1 + $0x88] sm:$0xff]  ;;  %v1278_v25 = vld [vmem:[%s1442_s10 + $0x20] sm:$0xf0]  ;;  %v1076_v29 = vld [vmem:[%s1442_s10 + $0x20] sm:$0xf] }
  0x1b   : > { %1300 = vmatpush.bf16.msra.mxu3 %v1255_v7  ;;  %688 = vmatpush.bf16.msra.mxu0 %v1255_v7  ;;  %v1070_v27 = vld [vmem:[%s1442_s10 + $0x24] sm:$0xf0]  ;;  %v1544_v28 = vld [vmem:[%s1690_s1 + $0x80] sm:$0xff]  ;;  %v1279_v30 = vld [vmem:[%s1442_s10 + $0x28] sm:$0xf0]  ;;  %v1069_v31 = vor.u32 %v1278_v25, %v1068_v24 }
  0x1c   : > { %1308 = vmatpush.bf16.msra.mxu1 %v1263_v8  ;;  %v1073_v32 = vor.u32 %v1277_v26, %v1070_v27  ;;  %v1077_v33 = vor.u32 %v1279_v30, %v1076_v29  ;;  %v1080_v34 = vld [vmem:[%s1442_s10 + $0x30] sm:$0xf]  ;;  %v1281_v35 = vld [vmem:[%s1442_s10 + $0x38] sm:$0xf0]  ;;  %v1280_v36 = vld [vmem:[%s1442_s10 + $0x34] sm:$0xf] }
  0x1d   : > { %1316 = vmatpush.bf16.msra.mxu2 %v1480_v9  ;;  %v1082_v37 = vld [vmem:[%s1442_s10 + $0x3c] sm:$0xf0]  ;;  %v1088_v38 = vld [vmem:[%s1442_s10 + $0x38] sm:$0xf]  ;;  %v1282_v39 = vld [vmem:[%s1442_s10 + $0x40] sm:$0xf0]  ;;  %v1081_v40 = vor.u32 %v1281_v35, %v1080_v34 }
  0x1e   : > { %v1085_v41 = vor.u32 %v1280_v36, %v1082_v37  ;;  %v1089_v42 = vor.u32 %v1282_v39, %v1088_v38  ;;  %v1056_v43 = vld [vmem:[%s1442_s10] sm:$0xf]  ;;  %v1275_v44 = vld [vmem:[%s1442_s10 + $0x8] sm:$0xf0]  ;;  %v1092_v46 = vld [vmem:[%s1442_s10 + $0x48] sm:$0xf] }
  0x1f   : > { %1301 = vmatpush.bf16.msra.mxu3 %v1254_v10  ;;  %689 = vmatpush.bf16.msra.mxu0 %v1254_v10  ;;  %v1057_v45 = vor.u32 %v1275_v44, %v1056_v43  ;;  %v1284_v47 = vld [vmem:[%s1442_s10 + $0x50] sm:$0xf0]  ;;  %v1283_v48 = vld [vmem:[%s1442_s10 + $0x4c] sm:$0xf]  ;;  %v1094_v49 = vld [vmem:[%s1442_s10 + $0x54] sm:$0xf0] }
  0x20   : > { %1309 = vmatpush.bf16.msra.mxu1 %v1262_v11  ;;  %v1100_v50 = vld [vmem:[%s1442_s10 + $0x50] sm:$0xf]  ;;  %v1285_v51 = vld [vmem:[%s1442_s10 + $0x58] sm:$0xf0]  ;;  %v1093_v52 = vor.u32 %v1284_v47, %v1092_v46  ;;  %v1097_v53 = vor.u32 %v1283_v48, %v1094_v49  ;;  %v1274_v55 = vld [vmem:[%s1442_s10 + $0x4] sm:$0xf] }
  0x21   : > { %1317 = vmatpush.bf16.msra.mxu2 %v1492_v12  ;;  %v1101_v54 = vor.u32 %v1285_v51, %v1100_v50  ;;  %v1058_v56 = vld [vmem:[%s1442_s10 + $0xc] sm:$0xf0]  ;;  %v1104_v58 = vld [vmem:[%s1442_s10 + $0x60] sm:$0xf]  ;;  %v1287_v59 = vld [vmem:[%s1442_s10 + $0x68] sm:$0xf0] }
  0x22   : > { %v1061_v57 = vor.u32 %v1274_v55, %v1058_v56  ;;  %v1286_v60 = vld [vmem:[%s1442_s10 + $0x64] sm:$0xf]  ;;  %v1106_v61 = vld [vmem:[%s1442_s10 + $0x6c] sm:$0xf0]  ;;  %v1112_v62 = vld [vmem:[%s1442_s10 + $0x68] sm:$0xf]  ;;  %v1105_v0 = vor.u32 %v1287_v59, %v1104_v58 }
  0x23   : > { %1302 = vmatpush.bf16.msra.mxu3 %v1253_v13  ;;  %690 = vmatpush.bf16.msra.mxu0 %v1253_v13  ;;  %v1288_v63 = vld [vmem:[%s1442_s10 + $0x70] sm:$0xf0]  ;;  %v1109_v1 = vor.u32 %v1286_v60, %v1106_v61  ;;  %v1290_v7 = vld [vmem:[%s1442_s10 + $0x80] sm:$0xf0]  ;;  %v1124_v10 = vld [vmem:[%s1442_s10 + $0x80] sm:$0xf] }
  0x24   : > { %1310 = vmatpush.bf16.msra.mxu1 %v1261_v14  ;;  %v1276_v4 = vld [vmem:[%s1442_s10 + $0x10] sm:$0xf0]  ;;  %v1140_v24 = vld [vmem:[%s1442_s10 + $0xa8] sm:$0xf]  ;;  %v1295_v26 = vld [vmem:[%s1442_s10 + $0xac] sm:$0xf] }
  0x25   : > { %1318 = vmatpush.bf16.msra.mxu2 %v1504_v15  ;;  %v1296_v25 = vld [vmem:[%s1442_s10 + $0xb0] sm:$0xf0]  ;;  %v1142_v27 = vld [vmem:[%s1442_s10 + $0xb4] sm:$0xf0]  ;;  %v1297_v29 = vld [vmem:[%s1442_s10 + $0xb8] sm:$0xf0] }
  0x26   : > { %v1141_v30 = vor.u32 %v1296_v25, %v1140_v24 }
  0x27   : > { %1303 = vmatpush.bf16.msra.mxu3 %v1252_v16  ;;  %691 = vmatpush.bf16.msra.mxu0 %v1252_v16  ;;  %v1293_v16 = vld [vmem:[%s1442_s10 + $0x98] sm:$0xf0] }
  0x28   : > { %1311 = vmatpush.bf16.msra.mxu1 %v1260_v17 }
  0x29   : > { %1319 = vmatpush.bf16.msra.mxu2 %v1516_v18 }
  0x2b   : > { %1304 = vmatpush.bf16.msra.mxu3 %v1251_v19  ;;  %692 = vmatpush.bf16.msra.mxu0 %v1251_v19  ;;  %v1136_v19 = vld [vmem:[%s1442_s10 + $0x98] sm:$0xf] }
  0x2c   : > { %1312 = vmatpush.bf16.msra.mxu1 %v1259_v20 }
  0x2d   : > { %1320 = vmatpush.bf16.msra.mxu2 %v1528_v21 }
  0x2f   : > { %1305 = vmatpush.bf16.msra.mxu3 %v1250_v22  ;;  %693 = vmatpush.bf16.msra.mxu0 %v1250_v22 }
  0x30   : > { %1313 = vmatpush.bf16.msra.mxu1 %v1258_v23 }
  0x31   : > { %1321 = vmatpush.bf16.msra.mxu2 %v1544_v28 }
  0x32   : > { %699 = vmatmul.bf16.vlgmr.msra.gmra.mxu3 %v1069_v31  ;;  %694 = vmatmul.bf16.vlgmr.msra.gmra.mxu0 %v1057_v45  ;;  %v1145_v31 = vor.u32 %v1295_v26, %v1142_v27 }
  0x33   : > { %735 = vmatpush.bf16.msrb.mxu0 %v1450_v2  ;;  %748 = vmatmul.bf16.vlgmr.msra.gmra.mxu1 %v1073_v32  ;;  %v1113_v2 = vor.u32 %v1288_v63, %v1112_v62 }
  0x34   : > { %797 = vmatmul.bf16.vlgmr.msra.gmra.mxu2 %v1077_v33 }
  0x37   : > { %736 = vmatpush.bf16.msrb.mxu0 %v1264_v5  ;;  %v1116_v5 = vld [vmem:[%s1442_s10 + $0x78] sm:$0xf] }
  0x3b   : > { %737 = vmatpush.bf16.msrb.mxu0 %v1263_v8  ;;  %v1289_v8 = vld [vmem:[%s1442_s10 + $0x7c] sm:$0xf] }
  0x3f   : > { %738 = vmatpush.bf16.msrb.mxu0 %v1262_v11  ;;  %v1291_v11 = vld [vmem:[%s1442_s10 + $0x88] sm:$0xf0] }
  0x42   : > { %704 = vmatmul.bf16.gmra.mxu3 %v1081_v40 }
  0x43   : > { %739 = vmatpush.bf16.msrb.mxu0 %v1261_v14  ;;  %753 = vmatmul.bf16.gmra.mxu1 %v1085_v41  ;;  %v1125_v14 = vor.u32 %v1291_v11, %v1124_v10 }
  0x44   : > { %802 = vmatmul.bf16.gmra.mxu2 %v1089_v42 }
  0x47   : > { %740 = vmatpush.bf16.msrb.mxu0 %v1260_v17  ;;  %v1292_v17 = vld [vmem:[%s1442_s10 + $0x94] sm:$0xf] }
  0x4b   : > { %741 = vmatpush.bf16.msrb.mxu0 %v1259_v20  ;;  %v1294_v20 = vld [vmem:[%s1442_s10 + $0xa0] sm:$0xf0] }
  0x4f   : > { %742 = vmatpush.bf16.msrb.mxu0 %v1258_v23  ;;  %v1137_v23 = vor.u32 %v1294_v20, %v1136_v19 }
  0x52   : > { %709 = vmatmul.bf16.gmra.mxu3 %v1093_v52  ;;  %743 = vmatmul.bf16.vlgmr.msrb.gmra.mxu0 %v1061_v57 }
  0x53   : > { %784 = vmatpush.bf16.msra.mxu0 %v1455_v3  ;;  %758 = vmatmul.bf16.gmra.mxu1 %v1097_v53  ;;  %v1064_v3 = vld [vmem:[%s1442_s10 + $0x8] sm:$0xf] }
  0x54   : > { %807 = vmatmul.bf16.gmra.mxu2 %v1101_v54 }
  0x57   : > { %785 = vmatpush.bf16.msra.mxu0 %v1468_v6  ;;  %v1065_v6 = vor.u32 %v1276_v4, %v1064_v3 }
  0x5b   : > { %786 = vmatpush.bf16.msra.mxu0 %v1480_v9  ;;  %v1118_v9 = vld [vmem:[%s1442_s10 + $0x84] sm:$0xf0] }
  0x5c   : > { %v1121_v13 = vor.u32 %v1289_v8, %v1118_v9 }
  0x5f   : > { %787 = vmatpush.bf16.msra.mxu0 %v1492_v12  ;;  %v1117_v12 = vor.u32 %v1290_v7, %v1116_v5 }
  0x62   : > { %714 = vmatmul.bf16.gmra.mxu3 %v1105_v0 }
  0x63   : > { %788 = vmatpush.bf16.msra.mxu0 %v1504_v15  ;;  %763 = vmatmul.bf16.gmra.mxu1 %v1109_v1  ;;  %v1128_v15 = vld [vmem:[%s1442_s10 + $0x90] sm:$0xf] }
  0x64   : > { %812 = vmatmul.bf16.gmra.mxu2 %v1113_v2 }
  0x67   : > { %789 = vmatpush.bf16.msra.mxu0 %v1516_v18  ;;  %v1130_v18 = vld [vmem:[%s1442_s10 + $0x9c] sm:$0xf0] }
  0x68   : > { %v1133_v22 = vor.u32 %v1292_v17, %v1130_v18 }
  0x6b   : > { %790 = vmatpush.bf16.msra.mxu0 %v1528_v21  ;;  %v1129_v21 = vor.u32 %v1293_v16, %v1128_v15 }
  0x6f   : > { %791 = vmatpush.bf16.msra.mxu0 %v1544_v28  ;;  %v1148_v28 = vld [vmem:[%s1442_s10 + $0xb0] sm:$0xf] }
  0x70   : > { %v1149_v32 = vor.u32 %v1297_v29, %v1148_v28 }
  0x72   : > { %792 = vmatmul.bf16.vlgmr.msra.gmra.mxu0 %v1065_v6  ;;  %719 = vmatmul.bf16.gmra.mxu3 %v1117_v12 }
  0x73   : > { %768 = vmatmul.bf16.gmra.mxu1 %v1121_v13 }
  0x74   : > { %817 = vmatmul.bf16.gmra.mxu2 %v1125_v14 }
  0x82   : > { %724 = vmatmul.bf16.gmra.mxu3 %v1129_v21 }
  0x83   : > { %773 = vmatmul.bf16.gmra.mxu1 %v1133_v22 }
  0x84   : > { %822 = vmatmul.bf16.gmra.mxu2 %v1137_v23 }
  0x92   : > { %729 = vmatmul.bf16.gmra.mxu3 %v1141_v30 }
  0x93   : > { %778 = vmatmul.bf16.gmra.mxu1 %v1145_v31 }
  0x94   : > { %827 = vmatmul.bf16.gmra.mxu2 %v1149_v32 }
  0xaf   : > { %v1612_v14 = vpop.f32.mrf.mxu0 }
  0xb0   : > { %v749_v33 = vpop.f32.mrf.mxu1 }
  0xb5   : > { %v700_v34 = vpop.f32.mrf.mxu3 }
  0xb6   : > { %v750_v35 = vadd.f32 %v749_v33, %v700_v34  ;;  %v1348_v33 = vld [vmem:[%s1691_s2] ss:$0 sm:$0xff] }
  0xb7   : > { %v798_v36 = vpop.f32.mrf.mxu2  ;;  %v697_v18 = vpop.f32.mrf.mxu0 }
  0xb8   : > { %v751_v37 = vpop.f32.mrf.mxu1  ;;  %v1600_v38 = vadd.f32 %v798_v36, %v750_v35 }
  0xbd   : > { %v702_v39 = vpop.f32.mrf.mxu3 }
  0xbe   : > { %v752_v40 = vadd.f32 %v751_v37, %v702_v39 }
  0xbf   : > { %v800_v41 = vpop.f32.mrf.mxu2 }
  0xc0   : > { %v754_v42 = vpop.f32.mrf.mxu1  ;;  %v1602_v43 = vadd.f32 %v800_v41, %v752_v40 }
  0xc5   : > { %v705_v44 = vpop.f32.mrf.mxu3 }
  0xc6   : > { %v755_v45 = vadd.f32 %v754_v42, %v705_v44 }
  0xc7   : > { %v803_v46 = vpop.f32.mrf.mxu2 }
  0xc8   : > { %v756_v47 = vpop.f32.mrf.mxu1  ;;  %v1604_v48 = vadd.f32 %v803_v46, %v755_v45 }
  0xcd   : > { %v707_v49 = vpop.f32.mrf.mxu3 }
  0xce   : > { %v757_v50 = vadd.f32 %v756_v47, %v707_v49 }
  0xcf   : > { %v805_v51 = vpop.f32.mrf.mxu2  ;;  %v744_v24 = vpop.f32.mrf.mxu0 }
  0xd0   : > { %v759_v52 = vpop.f32.mrf.mxu1  ;;  %v1606_v53 = vadd.f32 %v805_v51, %v757_v50 }
  0xd5   : > { %v710_v54 = vpop.f32.mrf.mxu3 }
  0xd6   : > { %v760_v55 = vadd.f32 %v759_v52, %v710_v54 }
  0xd7   : > { %v808_v56 = vpop.f32.mrf.mxu2  ;;  %v746_v37 = vpop.f32.mrf.mxu0 }
  0xd8   : > { %v761_v57 = vpop.f32.mrf.mxu1  ;;  %v1608_v58 = vadd.f32 %v808_v56, %v760_v55 }
  0xdd   : > { %v712_v59 = vpop.f32.mrf.mxu3 }
  0xde   : > { %v762_v60 = vadd.f32 %v761_v57, %v712_v59 }
  0xdf   : > { %v810_v61 = vpop.f32.mrf.mxu2 }
  0xe0   : > { %v764_v62 = vpop.f32.mrf.mxu1  ;;  %v1610_v63 = vadd.f32 %v810_v61, %v762_v60 }
  0xe5   : > { %v715_v0 = vpop.f32.mrf.mxu3 }
  0xe6   : > { %v765_v1 = vadd.f32 %v764_v62, %v715_v0 }
  0xe7   : > { %v813_v2 = vpop.f32.mrf.mxu2 }
  0xe8   : > { %v766_v3 = vpop.f32.mrf.mxu1  ;;  %v814_v4 = vadd.f32 %v813_v2, %v765_v1  ;;  %v895_v1 = vadd.f32 %v1348_v33, %v1610_v63  ;;  %v891_v63 = vadd.f32 %v1348_v33, %v1602_v43  ;;  %v921_v43 = vld [vmem:[%s1437_s7] sm:$0xff] }
  0xea   : > { %v896_v62 = vadd.f32 %v1348_v33, %v814_v4  ;;  %v745_v4 = vadd.f32 %v744_v24, %v1612_v14 }
  0xed   : > { %v717_v5 = vpop.f32.mrf.mxu3 }
  0xee   : > { %v767_v44 = vadd.f32 %v766_v3, %v717_v5  ;;  %v894_v3 = vadd.f32 %v1348_v33, %v1608_v58  ;;  %v912_v5 = vmax.f32 %v896_v62, 0.0  ;;  %v890_v58 = vadd.f32 %v1348_v33, %v1600_v38 }
  0xef   : > { %v815_v6 = vpop.f32.mrf.mxu2  ;;  %v793_v59 = vpop.f32.mrf.mxu0 }
  0xf0   : > { %v769_v7 = vpop.f32.mrf.mxu1  ;;  %v816_v52 = vadd.f32 %v815_v6, %v767_v44  ;;  %v893_v6 = vadd.f32 %v1348_v33, %v1606_v53  ;;  %v794_v53 = vadd.f32 %v793_v59, %v745_v4 }
  0xf2   : > { %v897_v60 = vadd.f32 %v1348_v33, %v816_v52 }
  0xf4   : > { %v913_v2 = vmax.f32 %v897_v60, 0.0 }
  0xf5   : > { %v720_v8 = vpop.f32.mrf.mxu3 }
  0xf6   : > { %v770_v39 = vadd.f32 %v769_v7, %v720_v8  ;;  %v911_v7 = vmax.f32 %v895_v1, 0.0  ;;  %v747_v8 = vadd.f32 %v746_v37, %v697_v18  ;;  %v906_v18 = vmax.f32 %v890_v58, 0.0 }
  0xf7   : > { %v818_v9 = vpop.f32.mrf.mxu2 }
  0xf8   : > { %v771_v10 = vpop.f32.mrf.mxu1  ;;  %v819_v49 = vadd.f32 %v818_v9, %v770_v39  ;;  %v795_v9 = vpop.f32.mrf.mxu0 }
  0xfa   : > { %v898_v56 = vadd.f32 %v1348_v33, %v819_v49 }
  0xfc   : > { %v914_v0 = vmax.f32 %v898_v56, 0.0 }
  0xfd   : > { %v722_v11 = vpop.f32.mrf.mxu3 }
  0xfe   : > { %v772_v34 = vadd.f32 %v771_v10, %v722_v11  ;;  %v892_v10 = vadd.f32 %v1348_v33, %v1604_v48  ;;  %v910_v11 = vmax.f32 %v894_v3, 0.0  ;;  %v888_v48 = vadd.f32 %v1348_v33, %v794_v53 }
  0xff   : > { %v820_v12 = vpop.f32.mrf.mxu2 }
 0x100   : > { %v774_v13 = vpop.f32.mrf.mxu1  ;;  %v821_v45 = vadd.f32 %v820_v12, %v772_v34  ;;  %v909_v12 = vmax.f32 %v893_v6, 0.0  ;;  %v904_v14 = vmax.f32 %v888_v48, 0.0 }
 0x102   : > { %v899_v54 = vadd.f32 %v1348_v33, %v821_v45 }
 0x104   : > { %v915_v61 = vmax.f32 %v899_v54, 0.0 }
 0x105   : > { %v725_v15 = vpop.f32.mrf.mxu3 }
 0x106   : > { %v775_v29 = vadd.f32 %v774_v13, %v725_v15  ;;  %v796_v13 = vadd.f32 %v795_v9, %v747_v8  ;;  %v908_v15 = vmax.f32 %v892_v10, 0.0 }
 0x107   : > { %v823_v16 = vpop.f32.mrf.mxu2 }
 0x108   : > { %v776_v17 = vpop.f32.mrf.mxu1  ;;  %v824_v40 = vadd.f32 %v823_v16, %v775_v29  ;;  %v907_v16 = vmax.f32 %v891_v63, 0.0 }
 0x10a   : > { %v900_v50 = vadd.f32 %v1348_v33, %v824_v40 }
 0x10c   : > { %v916_v57 = vmax.f32 %v900_v50, 0.0 }
 0x10d   : > { %v727_v19 = vpop.f32.mrf.mxu3 }
 0x10e   : > { %v777_v26 = vadd.f32 %v776_v17, %v727_v19  ;;  %v889_v17 = vadd.f32 %v1348_v33, %v796_v13 }
 0x10f   : > { %v825_v20 = vpop.f32.mrf.mxu2 }
 0x110   : > { %v779_v21 = vpop.f32.mrf.mxu1  ;;  %v826_v35 = vadd.f32 %v825_v20, %v777_v26  ;;  %v905_v19 = vmax.f32 %v889_v17, 0.0  ;;  %v920_v20 = vld [vmem:[#allocation3] sm:$0xff] }
 0x112   : > { %v901_v46 = vadd.f32 %v1348_v33, %v826_v35 }
 0x114   : > { %v917_v55 = vmax.f32 %v901_v46, 0.0 }
 0x115   : > { %v730_v22 = vpop.f32.mrf.mxu3 }
 0x116   : > { %v780_v25 = vadd.f32 %v779_v21, %v730_v22 }
 0x117   : > { %v828_v23 = vpop.f32.mrf.mxu2 }
 0x118   : > { %v781_v27 = vpop.f32.mrf.mxu1  ;;  %v829_v30 = vadd.f32 %v828_v23, %v780_v25 }
 0x11a   : > { %v902_v41 = vadd.f32 %v1348_v33, %v829_v30 }
 0x11c   : > { %v918_v51 = vmax.f32 %v902_v41, 0.0 }
 0x11d   : > { %v732_v28 = vpop.f32.mrf.mxu3 }
 0x11e   : > { %v782_v31 = vadd.f32 %v781_v27, %v732_v28 }
 0x11f   : > { %v830_v32 = vpop.f32.mrf.mxu2 }
 0x120   : > { %v831_v36 = vadd.f32 %v830_v32, %v782_v31 }
 0x122   : > { %v903_v42 = vadd.f32 %v1348_v33, %v831_v36 }
 0x124   : > { %v919_v47 = vmax.f32 %v903_v42, 0.0 }
 0x126   : > { %922 = vmatpush.msrb.mxu0 %v919_v47 }
 0x128   : > { %923 = vmatpush.msrb.mxu0 %v918_v51 }
 0x12a   : > { %924 = vmatpush.msrb.mxu0 %v917_v55 }
 0x12c   : > { %925 = vmatpush.msrb.mxu0 %v916_v57 }
 0x12e   : > { %926 = vmatpush.msrb.mxu0 %v915_v61 }
 0x130   : > { %927 = vmatpush.msrb.mxu0 %v914_v0 }
 0x132   : > { %928 = vmatpush.msrb.mxu0 %v913_v2 }
 0x134   : > { %929 = vmatpush.msrb.mxu0 %v912_v5 }
 0x136   : > { %930 = vmatpush.msrb.mxu0 %v911_v7 }
 0x138   : > { %931 = vmatpush.msrb.mxu0 %v910_v11 }
 0x13a   : > { %932 = vmatpush.msrb.mxu0 %v909_v12 }
 0x13c   : > { %933 = vmatpush.msrb.mxu0 %v908_v15 }
 0x13e   : > { %934 = vmatpush.msrb.mxu0 %v907_v16 }
 0x140   : > { %935 = vmatpush.msrb.mxu0 %v906_v18 }
 0x142   : > { %936 = vmatpush.msrb.mxu0 %v905_v19 }
 0x144   : > { %937 = vmatpush.msrb.mxu0 %v904_v14 }
 0x145   : > { %938 = vmatmul.f32.vlgmr.msrb.gmra.mxu0 %v921_v43 }
 0x1c1   : > { %947 = sbr.rel (%p1246_p7) target bundleno = 615 (0x267), region = 60 }
 0x1c2   : > { %v939_v21 = vpop.f32.mrf.mxu0 }
 0x1c3   : > { %v942_v22 = vadd.f32 %v939_v21, %v920_v20 }
 0x1c5   : > { %943 = vst [vmem:[#allocation3] sm:$0xff] %v942_v22 }
 0x1c6   : > { %v964_v38 = vld [vmem:[%s1693_s4 + $0x78] sm:$0xff]  ;;  %v963_v23 = vld [vmem:[%s1693_s4 + $0x70] sm:$0xff]  ;;  %v962_v24 = vld [vmem:[%s1693_s4 + $0x68] sm:$0xff] }
 0x1c7   : > { %969 = vmatpush.msra.mxu0 %v964_v38  ;;  %v961_v25 = vld [vmem:[%s1693_s4 + $0x60] sm:$0xff]  ;;  %v960_v26 = vld [vmem:[%s1693_s4 + $0x58] sm:$0xff]  ;;  %v959_v27 = vld [vmem:[%s1693_s4 + $0x50] sm:$0xff] }
 0x1c8   : > { %v958_v28 = vld [vmem:[%s1693_s4 + $0x48] sm:$0xff]  ;;  %v957_v29 = vld [vmem:[%s1693_s4 + $0x40] sm:$0xff]  ;;  %v956_v30 = vld [vmem:[%s1693_s4 + $0x38] sm:$0xff] }
 0x1c9   : > { %970 = vmatpush.msra.mxu0 %v963_v23  ;;  %v955_v31 = vld [vmem:[%s1693_s4 + $0x30] sm:$0xff]  ;;  %v954_v32 = vld [vmem:[%s1693_s4 + $0x28] sm:$0xff]  ;;  %v953_v33 = vld [vmem:[%s1693_s4 + $0x20] sm:$0xff] }
 0x1ca   : > { %v952_v34 = vld [vmem:[%s1693_s4 + $0x18] sm:$0xff]  ;;  %v951_v35 = vld [vmem:[%s1693_s4 + $0x10] sm:$0xff]  ;;  %v950_v36 = vld [vmem:[%s1693_s4 + $0x8] sm:$0xff] }
 0x1cb   : > { %971 = vmatpush.msra.mxu0 %v962_v24  ;;  %v949_v37 = vld [vmem:[%s1693_s4] sm:$0xff] }
 0x1cc   : > { %v948_v39 = vld [vmem:[#allocation3] sm:$0xff] }
 0x1cd   : > { %972 = vmatpush.msra.mxu0 %v961_v25  ;;  %v1349_v40 = vld [vmem:[%s1694_s5] ss:$0 sm:$0xff] }
 0x1cf   : > { %973 = vmatpush.msra.mxu0 %v960_v26 }
 0x1d1   : > { %974 = vmatpush.msra.mxu0 %v959_v27 }
 0x1d3   : > { %975 = vmatpush.msra.mxu0 %v958_v28 }
 0x1d5   : > { %976 = vmatpush.msra.mxu0 %v957_v29 }
 0x1d7   : > { %977 = vmatpush.msra.mxu0 %v956_v30 }
 0x1d9   : > { %978 = vmatpush.msra.mxu0 %v955_v31 }
 0x1db   : > { %979 = vmatpush.msra.mxu0 %v954_v32 }
 0x1dd   : > { %980 = vmatpush.msra.mxu0 %v953_v33 }
 0x1df   : > { %981 = vmatpush.msra.mxu0 %v952_v34 }
 0x1e1   : > { %982 = vmatpush.msra.mxu0 %v951_v35 }
 0x1e3   : > { %983 = vmatpush.msra.mxu0 %v950_v36 }
 0x1e5   : > { %984 = vmatpush.msra.mxu0 %v949_v37 }
 0x1e6   : > { %985 = vmatmul.f32.vlgmr.msra.gmra.mxu0 %v948_v39 }
 0x263   : > { %v986_v41 = vpop.f32.mrf.mxu0 }
 0x264   : > { %v987_v42 = vadd.f32 %v1349_v40, %v986_v41 }
 0x266   : > { %989 = vst [vmem:[%s1695_s6] sm:$0xff] %v987_v42 }
 0x267 PF: > { %s16_s23 = sadd.s32 1, %s1372_s23   ;;  %s1696_s21 = smov %s1368_s22 }
 0x268   : > { %p13_p8 = scmp.ge.s32.totalorder %s16_s23, 5   ;;  %s1697_s22 = smov %s1699_s24 }
 0x26a   :  { %15 = sbr.rel (!%p13_p8) target bundleno = 2 (0x2), region = 90 }

</bundles_post_ra>
